<compile_context>
chip_gen: v6e
topology: v6e:2x2x1
jax: 0.10.0
libtpu: 0.0.40
codegen_flags: <defaults>
</compile_context>

<pallas_src>
import math

import jax
import jax.numpy as jnp
from jax.experimental import pallas as pl
from jax.experimental.pallas import tpu as pltpu

# ----------------------------- small config ---------------------------------
VOCAB = 32
EMBED_DIM = 32        # opt.embed_dim  (D)
HIDDEN = 16           # opt.hidden_dim (H) -> conv channels C = 2H = 32
POLAR = 3             # opt.polarities_dim
B = 2
S = 8
C = 2 * HIDDEN        # 32
FC_PAD = 128          # lane-dense FC output width (first POLAR cols are real)


# ------------------------------- kernel -------------------------------------
def pwcn_dep_kernel(x2_ref, wx2_ref, wh2_ref, b2_ref, msk_ref, wgt_ref,
                    valid_ref, convw_ref, convb_ref, fcw_ref, fcb_ref,
                    out_ref, lstm_scr):
    SB, twoH = lstm_scr.shape          # (S*B, 2H)
    H = twoH // 2
    Bn = out_ref.shape[0]
    Sn = SB // Bn

    # ---- bidirectional LSTM as one fused recurrence -------------------------
    # Hoisted input projection for BOTH directions + biases: one 128-lane matmul.
    # Column layout: [i_f | i_b | f_f | f_b | o_f | o_b | g_f | g_b]
    xp = jnp.dot(x2_ref[...], wx2_ref[...],
                 preferred_element_type=jnp.float32) + b2_ref[...]      # (SB, 8H)
    wh2 = wh2_ref[...]                                                   # (2H, 8H)
    msk = msk_ref[...]                                                   # (SB, 2H)

    h = jnp.zeros((Bn, twoH), jnp.float32)   # [h_fwd | h_bwd]
    c = jnp.zeros((Bn, twoH), jnp.float32)
    # Static Python unroll (S is small & fixed) -> static slices/stores and
    # full scheduler visibility across iterations.
    for s in range(Sn):
        r0 = s * Bn
        gates = xp[r0:r0 + Bn, :] + jnp.dot(
            h, wh2, preferred_element_type=jnp.float32)                  # (B, 8H)
        sig = jax.nn.sigmoid(gates[:, :6 * H])     # [i | f | o] in one block
        g = jnp.tanh(gates[:, 6 * H:])             # g block
        i_g = sig[:, 0:twoH]
        f_g = sig[:, twoH:2 * twoH]
        o_g = sig[:, 2 * twoH:3 * twoH]
        c_new = f_g * c + i_g * g
        h_new = o_g * jnp.tanh(c_new)
        m = msk[r0:r0 + Bn, :]                     # per-direction validity mask
        h_out = m * h_new                          # zero past text_len (pad_packed)
        lstm_scr[r0:r0 + Bn, 0:H] = h_out[:, 0:H]            # fwd half @ time s
        rb = (Sn - 1 - s) * Bn
        lstm_scr[rb:rb + Bn, H:twoH] = h_out[:, H:twoH]      # bwd half @ time S-1-s
        h = h_out + (1.0 - m) * h
        c = m * c_new + (1.0 - m) * c

    lstm_out = lstm_scr[...]                                             # (SB, 2H)

    # ---- dependency-proximity weighting --------------------------------------
    weighted = wgt_ref[...] * lstm_out                                   # (SB, C)

    # ---- conv1d(k=3, pad=1) as ONE (SB, 3C) x (3C, C) matmul ------------------
    zb = jnp.zeros((Bn, twoH), jnp.float32)
    x_prev = jnp.concatenate([zb, weighted[:SB - Bn, :]], axis=0)        # x[t-1]
    x_next = jnp.concatenate([weighted[Bn:, :], zb], axis=0)             # x[t+1]
    x3 = jnp.concatenate([x_prev, weighted, x_next], axis=1)             # (SB, 3C)
    y = jnp.dot(x3, convw_ref[...],
                preferred_element_type=jnp.float32) + convb_ref[...]
    y = jnp.maximum(y, 0.0) * valid_ref[...]   # ReLU + truncate to max(text_len)

    # ---- max-pool over time + FC (lane-padded output) -------------------------
    z = jnp.max(y.reshape(Sn, Bn, twoH), axis=0)                         # (B, C)
    out_ref[...] = jnp.dot(z, fcw_ref[...],
                           preferred_element_type=jnp.float32) + fcb_ref[...]


# ----------------------------- parameters -----------------------------------
def init_params(key):
    ks = jax.random.split(key, 8)

    def unif(k, shape, scale):
        return jax.random.uniform(k, shape, jnp.float32, -scale, scale)

    emb = jax.random.normal(ks[0], (VOCAB, EMBED_DIM), jnp.float32) * 0.1
    emb = emb.at[0].set(0.0)

    def lstm_params(k):
        k1, k2, k3, k4 = jax.random.split(k, 4)
        sc = 1.0 / math.sqrt(HIDDEN)
        w_ih = unif(k1, (4 * HIDDEN, EMBED_DIM), sc)
        w_hh = unif(k2, (4 * HIDDEN, HIDDEN), sc)
        b = unif(k3, (4 * HIDDEN,), sc) + unif(k4, (4 * HIDDEN,), sc)
        d = {}
        for gi, n in enumerate(["i", "f", "g", "o"]):   # PyTorch gate order
            sl = slice(gi * HIDDEN, (gi + 1) * HIDDEN)
            d["wx" + n] = w_ih[sl].T                    # (D, H)
            d["wh" + n] = w_hh[sl].T                    # (H, H)
            d["b" + n] = b[sl].reshape(1, HIDDEN)
        return d

    lstm_f = lstm_params(ks[1])
    lstm_b = lstm_params(ks[2])

    sc_c = 1.0 / math.sqrt(C * 3)
    conv_w = unif(ks[3], (C, C, 3), sc_c)               # (C_out, C_in, 3)
    conv_b = unif(ks[4], (C,), sc_c)
    sc_l = 1.0 / math.sqrt(C)
    fc_w = unif(ks[5], (POLAR, C), sc_l)
    fc_b = unif(ks[6], (POLAR,), sc_l)

    return {
        "embedding": emb,
        "lstm_f": lstm_f, "lstm_b": lstm_b,
        "cw0": conv_w[:, :, 0].T, "cw1": conv_w[:, :, 1].T,
        "cw2": conv_w[:, :, 2].T,
        "cb": conv_b.reshape(1, C),
        "fcw": fc_w.T, "fcb": fc_b.reshape(1, POLAR),
    }


# ------------------------------- wrapper -------------------------------------
def pwcn_dep_pallas(params, text_indices, aspect_indices, left_indices,
                    dependency_dist):
    Bn, Sn = text_indices.shape
    H, D = HIDDEN, EMBED_DIM
    f32 = lambda a: a.astype(jnp.float32)

    txt_len = jnp.sum(text_indices != 0, axis=1).astype(jnp.int32)
    asp_len = jnp.sum(aspect_indices != 0, axis=1).astype(jnp.int32)
    left_len = jnp.sum(left_indices != 0, axis=-1).astype(jnp.int32)
    asp_start = left_len
    asp_end = left_len + asp_len - 1
    ctx_len = f32(txt_len - asp_len)

    # --- embedding gather (glue); time-major slab + time-reversed copy --------
    x = jnp.take(params["embedding"], text_indices, axis=0)        # (B,S,D)
    # embed_dropout: eval-mode identity
    x_tm = f32(jnp.transpose(x, (1, 0, 2)))                        # (S,B,D)
    x2 = jnp.concatenate([x_tm, x_tm[::-1]], axis=-1).reshape(Sn * Bn, 2 * D)

    # --- packed LSTM weights: gate-grouped columns [i_f i_b f_f f_b o_f o_b g_f g_b]
    lf, lb = params["lstm_f"], params["lstm_b"]
    zD = jnp.zeros((D, H), jnp.float32)
    zH = jnp.zeros((H, H), jnp.float32)
    wx2 = jnp.concatenate([
        jnp.concatenate([lf["wxi"], zD, lf["wxf"], zD,
                         lf["wxo"], zD, lf["wxg"], zD], axis=1),
        jnp.concatenate([zD, lb["wxi"], zD, lb["wxf"],
                         zD, lb["wxo"], zD, lb["wxg"]], axis=1),
    ], axis=0)                                                     # (2D, 8H)
    wh2 = jnp.concatenate([
        jnp.concatenate([lf["whi"], zH, lf["whf"], zH,
                         lf["who"], zH, lf["whg"], zH], axis=1),
        jnp.concatenate([zH, lb["whi"], zH, lb["whf"],
                         zH, lb["who"], zH, lb["whg"]], axis=1),
    ], axis=0)                                                     # (2H, 8H)
    b2 = jnp.concatenate([lf["bi"], lb["bi"], lf["bf"], lb["bf"],
                          lf["bo"], lb["bo"], lf["bg"], lb["bg"]], axis=1)  # (1, 8H)

    # --- per-step validity masks (fwd half: t=s, bwd half: t=S-1-s) -----------
    tcol = jnp.arange(Sn, dtype=jnp.float32)[:, None]              # (S,1)
    tlr = f32(txt_len)[None, :]                                    # (1,B)
    m_f = (tcol < tlr).astype(jnp.float32)                         # (S,B)
    m_b = ((Sn - 1 - tcol) < tlr).astype(jnp.float32)
    msk = jnp.concatenate([
        jnp.broadcast_to(m_f[:, :, None], (Sn, Bn, H)),
        jnp.broadcast_to(m_b[:, :, None], (Sn, Bn, H))],
        axis=2).reshape(Sn * Bn, 2 * H)

    # --- dependency-proximity weights (host-side numpy in the original) -------
    trow = jnp.arange(Sn, dtype=jnp.float32)[None, :]              # (1,S)
    in_text = trow < f32(txt_len)[:, None]
    in_asp = (trow >= f32(asp_start)[:, None]) & (trow <= f32(asp_end)[:, None])
    wgt_bs = jnp.where(in_text & ~in_asp,
                       1.0 - f32(dependency_dist) / ctx_len[:, None], 0.0)  # (B,S)
    wgt = jnp.transpose(wgt_bs).reshape(Sn * Bn, 1)

    # --- pooling validity: pad_packed truncation to max(text_len) -------------
    valid = (jnp.arange(Sn, dtype=jnp.float32) < f32(jnp.max(txt_len)))
    valid = jnp.broadcast_to(valid.astype(jnp.float32)[:, None, None],
                             (Sn, Bn, 1)).reshape(Sn * Bn, 1)

    # --- conv / fc weight packing ----------------------------------------------
    convw = jnp.concatenate([params["cw0"], params["cw1"], params["cw2"]],
                            axis=0)                                # (3C, C)
    convb = params["cb"]                                           # (1, C)
    fcw = jnp.concatenate(
        [params["fcw"], jnp.zeros((C, FC_PAD - POLAR), jnp.float32)], axis=1)
    fcb = jnp.concatenate(
        [params["fcb"], jnp.zeros((1, FC_PAD - POLAR), jnp.float32)], axis=1)

    args = [x2, wx2, wh2, b2, msk, wgt, valid, convw, convb, fcw, fcb]
    vmem = pl.BlockSpec(memory_space=pltpu.MemorySpace.VMEM)
    out = pl.pallas_call(
        pwcn_dep_kernel,
        out_shape=jax.ShapeDtypeStruct((Bn, FC_PAD), jnp.float32),
        in_specs=[vmem] * len(args),
        out_specs=vmem,
        scratch_shapes=[pltpu.VMEM((Sn * Bn, 2 * H), jnp.float32)],
    )(*args)
    return out[:, :POLAR]


# ------------------------- pure-JAX reference --------------------------------
def ref_forward(p, text_indices, aspect_indices, left_indices, dep_dist):
    Bn, Sn = text_indices.shape
    txt_len = jnp.sum(text_indices != 0, axis=1).astype(jnp.int32)
    asp_len = jnp.sum(aspect_indices != 0, axis=1).astype(jnp.int32)
    left_len = jnp.sum(left_indices != 0, axis=-1).astype(jnp.int32)
    asp_start, asp_end = left_len, left_len + asp_len - 1
    ctx = (txt_len - asp_len).astype(jnp.float32)

    x = jnp.take(p["embedding"], text_indices, axis=0)

    def run_dir(order, w):
        h = jnp.zeros((Bn, HIDDEN)); c = jnp.zeros((Bn, HIDDEN))
        outs = [None] * Sn
        for t in order:
            xt = x[:, t, :]
            ig = jax.nn.sigmoid(xt @ w["wxi"] + h @ w["whi"] + w["bi"])
            fg = jax.nn.sigmoid(xt @ w["wxf"] + h @ w["whf"] + w["bf"])
            gg = jnp.tanh(xt @ w["wxg"] + h @ w["whg"] + w["bg"])
            og = jax.nn.sigmoid(xt @ w["wxo"] + h @ w["who"] + w["bo"])
            c_new = fg * c + ig * gg
            h_new = og * jnp.tanh(c_new)
            m = (t < txt_len).astype(jnp.float32)[:, None]
            h_out = m * h_new
            outs[t] = h_out
            h = h_out + (1 - m) * h
            c = m * c_new + (1 - m) * c
        return jnp.stack(outs, axis=1)

    fwd = run_dir(range(Sn), p["lstm_f"])
    bwd = run_dir(range(Sn - 1, -1, -1), p["lstm_b"])
    lstm_out = jnp.concatenate([fwd, bwd], axis=-1)            # (B,S,C)

    ti = jnp.arange(Sn)[None, :].astype(jnp.float32)
    tl = txt_len.astype(jnp.float32)[:, None]
    a_s = asp_start.astype(jnp.float32)[:, None]
    a_e = asp_end.astype(jnp.float32)[:, None]
    wgt = jnp.where((ti < tl) & ~((ti >= a_s) & (ti <= a_e)),
                    1.0 - dep_dist.astype(jnp.float32) / ctx[:, None], 0.0)
    weighted = wgt[:, :, None] * lstm_out

    xp = jnp.pad(weighted, ((0, 0), (1, 1), (0, 0)))
    y = (xp[:, 0:Sn] @ p["cw0"] + xp[:, 1:Sn + 1] @ p["cw1"]
         + xp[:, 2:Sn + 2] @ p["cw2"] + p["cb"])
    y = jnp.maximum(y, 0.0)
    max_len = int(jnp.max(txt_len))
    z = jnp.max(y[:, :max_len], axis=1)
    return z @ p["fcw"] + p["fcb"]


# --------------------------------- main --------------------------------------
if __name__ == "__main__":
    key = jax.random.PRNGKey(0)
    kp, kd = jax.random.split(key)
    params = init_params(kp)

    # text lengths: 8 and 6; aspect spans: [3,4] and [2,2]
    text_indices = jnp.array([[3, 5, 2, 7, 1, 4, 6, 2],
                              [2, 4, 3, 5, 1, 6, 0, 0]], dtype=jnp.int32)
    aspect_indices = jnp.array([[7, 1, 0],
                                [3, 0, 0]], dtype=jnp.int32)
    left_indices = jnp.array([[3, 5, 2, 0, 0, 0, 0, 0],
                              [2, 4, 0, 0, 0, 0, 0, 0]], dtype=jnp.int32)
    dependency_dist = jax.random.randint(kd, (B, S), 0, 5).astype(jnp.int32)

    out = pwcn_dep_pallas(params, text_indices, aspect_indices, left_indices,
                          dependency_dist)
    out = jax.block_until_ready(out)
    assert out.shape == (B, POLAR)

    # Reference evaluated at highest matmul precision (accurate oracle); the
    # kernel runs at default MXU precision, so allow a few e-3 of slack for
    # bf16-pass accumulation differences.
    with jax.default_matmul_precision("highest"):
        ref = ref_forward(params, text_indices, aspect_indices, left_indices,
                          dependency_dist)
    if not bool(jnp.allclose(out, ref, atol=5e-3, rtol=5e-3)):
        raise AssertionError(f"mismatch:\nkernel={out}\nref={ref}")

    print("KERNEL_OK")
</pallas_src>

<mosaic_0001>
module attributes {stable_mosaic.version = 11 : i64} {
  func.func @pwcn_dep_kernel(%arg0: memref<16x64xf32, #tpu.memory_space<vmem>>, %arg1: memref<64x128xf32, #tpu.memory_space<vmem>>, %arg2: memref<32x128xf32, #tpu.memory_space<vmem>>, %arg3: memref<1x128xf32, #tpu.memory_space<vmem>>, %arg4: memref<16x32xf32, #tpu.memory_space<vmem>>, %arg5: memref<16x1xf32, #tpu.memory_space<vmem>>, %arg6: memref<16x1xf32, #tpu.memory_space<vmem>>, %arg7: memref<96x32xf32, #tpu.memory_space<vmem>>, %arg8: memref<1x32xf32, #tpu.memory_space<vmem>>, %arg9: memref<32x128xf32, #tpu.memory_space<vmem>>, %arg10: memref<1x128xf32, #tpu.memory_space<vmem>>, %arg11: memref<2x128xf32, #tpu.memory_space<vmem>>, %arg12: memref<16x32xf32, #tpu.memory_space<vmem>>) attributes {dimension_semantics = [], scalar_prefetch = 0 : i64, scratch_operands = 1 : i64, tpu.core_type = #tpu.core_type<tc>} {
    %c0 = arith.constant 0 : index
    %c0_0 = arith.constant 0 : index
    %0 = vector.load %arg0[%c0, %c0_0] : memref<16x64xf32, #tpu.memory_space<vmem>>, vector<16x64xf32>
    %c0_1 = arith.constant 0 : index
    %c0_2 = arith.constant 0 : index
    %1 = vector.load %arg1[%c0_1, %c0_2] : memref<64x128xf32, #tpu.memory_space<vmem>>, vector<64x128xf32>
    %cst = arith.constant dense<0.000000e+00> : vector<16x128xf32>
    %2 = tpu.matmul %0, %1, %cst {dimension_numbers = #tpu.dot_dimension_numbers<[1], [0], [0], [1], [0, 0, 1, 1], [], []>} : vector<16x64xf32>, vector<64x128xf32>, vector<16x128xf32> -> vector<16x128xf32>
    %c0_3 = arith.constant 0 : index
    %c0_4 = arith.constant 0 : index
    %3 = vector.load %arg3[%c0_3, %c0_4] : memref<1x128xf32, #tpu.memory_space<vmem>>, vector<1x128xf32>
    %4 = vector.broadcast %3 : vector<1x128xf32> to vector<16x128xf32>
    %5 = arith.addf %2, %4 : vector<16x128xf32>
    %c0_5 = arith.constant 0 : index
    %c0_6 = arith.constant 0 : index
    %6 = vector.load %arg2[%c0_5, %c0_6] : memref<32x128xf32, #tpu.memory_space<vmem>>, vector<32x128xf32>
    %c0_7 = arith.constant 0 : index
    %c0_8 = arith.constant 0 : index
    %7 = vector.load %arg4[%c0_7, %c0_8] : memref<16x32xf32, #tpu.memory_space<vmem>>, vector<16x32xf32>
    %cst_9 = arith.constant 0.000000e+00 : f32
    %8 = vector.broadcast %cst_9 : f32 to vector<2x32xf32>
    %cst_10 = arith.constant 0.000000e+00 : f32
    %9 = vector.broadcast %cst_10 : f32 to vector<2x32xf32>
    %10 = vector.extract_strided_slice %5 {offsets = [0, 0], sizes = [2, 128], strides = [1, 1]} : vector<16x128xf32> to vector<2x128xf32>
    %cst_11 = arith.constant dense<0.000000e+00> : vector<2x128xf32>
    %11 = tpu.matmul %8, %6, %cst_11 {dimension_numbers = #tpu.dot_dimension_numbers<[1], [0], [0], [1], [0, 0, 1, 1], [], []>} : vector<2x32xf32>, vector<32x128xf32>, vector<2x128xf32> -> vector<2x128xf32>
    %12 = arith.addf %10, %11 : vector<2x128xf32>
    %13 = vector.extract_strided_slice %12 {offsets = [0, 0], sizes = [2, 96], strides = [1, 1]} : vector<2x128xf32> to vector<2x96xf32>
    %14 = arith.negf %13 : vector<2x96xf32>
    %15 = math.exp %14 : vector<2x96xf32>
    %cst_12 = arith.constant 1.000000e+00 : f32
    %16 = vector.broadcast %cst_12 : f32 to vector<2x96xf32>
    %17 = arith.addf %16, %15 : vector<2x96xf32>
    %18 = arith.divf %16, %17 : vector<2x96xf32>
    %19 = vector.extract_strided_slice %12 {offsets = [0, 96], sizes = [2, 32], strides = [1, 1]} : vector<2x128xf32> to vector<2x32xf32>
    %20 = math.tanh %19 : vector<2x32xf32>
    %21 = vector.extract_strided_slice %18 {offsets = [0, 0], sizes = [2, 32], strides = [1, 1]} : vector<2x96xf32> to vector<2x32xf32>
    %22 = vector.extract_strided_slice %18 {offsets = [0, 32], sizes = [2, 32], strides = [1, 1]} : vector<2x96xf32> to vector<2x32xf32>
    %23 = vector.extract_strided_slice %18 {offsets = [0, 64], sizes = [2, 32], strides = [1, 1]} : vector<2x96xf32> to vector<2x32xf32>
    %24 = arith.mulf %22, %9 : vector<2x32xf32>
    %25 = arith.mulf %21, %20 : vector<2x32xf32>
    %26 = arith.addf %24, %25 : vector<2x32xf32>
    %27 = math.tanh %26 : vector<2x32xf32>
    %28 = arith.mulf %23, %27 : vector<2x32xf32>
    %29 = vector.extract_strided_slice %7 {offsets = [0, 0], sizes = [2, 32], strides = [1, 1]} : vector<16x32xf32> to vector<2x32xf32>
    %30 = arith.mulf %29, %28 : vector<2x32xf32>
    %31 = vector.extract_strided_slice %30 {offsets = [0, 0], sizes = [2, 16], strides = [1, 1]} : vector<2x32xf32> to vector<2x16xf32>
    %c0_13 = arith.constant 0 : index
    %c0_14 = arith.constant 0 : index
    %32 = vector.load %arg12[%c0_13, %c0_14] : memref<16x32xf32, #tpu.memory_space<vmem>>, vector<2x16xf32>
    tpu.vector_store %arg12[%c0_13, %c0_14], %31 {strides = array<i32>} : memref<16x32xf32, #tpu.memory_space<vmem>>, vector<2x16xf32>,
    %33 = vector.extract_strided_slice %30 {offsets = [0, 16], sizes = [2, 16], strides = [1, 1]} : vector<2x32xf32> to vector<2x16xf32>
    %c14 = arith.constant 14 : index
    %c16 = arith.constant 16 : index
    %34 = vector.load %arg12[%c14, %c16] : memref<16x32xf32, #tpu.memory_space<vmem>>, vector<2x16xf32>
    tpu.vector_store %arg12[%c14, %c16], %33 {strides = array<i32>} : memref<16x32xf32, #tpu.memory_space<vmem>>, vector<2x16xf32>,
    %cst_15 = arith.constant 1.000000e+00 : f32
    %35 = vector.broadcast %cst_15 : f32 to vector<2x32xf32>
    %36 = arith.subf %35, %29 : vector<2x32xf32>
    %37 = arith.mulf %36, %8 : vector<2x32xf32>
    %38 = arith.addf %30, %37 : vector<2x32xf32>
    %39 = arith.mulf %29, %26 : vector<2x32xf32>
    %cst_16 = arith.constant 1.000000e+00 : f32
    %40 = vector.broadcast %cst_16 : f32 to vector<2x32xf32>
    %41 = arith.subf %40, %29 : vector<2x32xf32>
    %42 = arith.mulf %41, %9 : vector<2x32xf32>
    %43 = arith.addf %39, %42 : vector<2x32xf32>
    %44 = vector.extract_strided_slice %5 {offsets = [2, 0], sizes = [2, 128], strides = [1, 1]} : vector<16x128xf32> to vector<2x128xf32>
    %cst_17 = arith.constant dense<0.000000e+00> : vector<2x128xf32>
    %45 = tpu.matmul %38, %6, %cst_17 {dimension_numbers = #tpu.dot_dimension_numbers<[1], [0], [0], [1], [0, 0, 1, 1], [], []>} : vector<2x32xf32>, vector<32x128xf32>, vector<2x128xf32> -> vector<2x128xf32>
    %46 = arith.addf %44, %45 : vector<2x128xf32>
    %47 = vector.extract_strided_slice %46 {offsets = [0, 0], sizes = [2, 96], strides = [1, 1]} : vector<2x128xf32> to vector<2x96xf32>
    %48 = arith.negf %47 : vector<2x96xf32>
    %49 = math.exp %48 : vector<2x96xf32>
    %cst_18 = arith.constant 1.000000e+00 : f32
    %50 = vector.broadcast %cst_18 : f32 to vector<2x96xf32>
    %51 = arith.addf %50, %49 : vector<2x96xf32>
    %52 = arith.divf %50, %51 : vector<2x96xf32>
    %53 = vector.extract_strided_slice %46 {offsets = [0, 96], sizes = [2, 32], strides = [1, 1]} : vector<2x128xf32> to vector<2x32xf32>
    %54 = math.tanh %53 : vector<2x32xf32>
    %55 = vector.extract_strided_slice %52 {offsets = [0, 0], sizes = [2, 32], strides = [1, 1]} : vector<2x96xf32> to vector<2x32xf32>
    %56 = vector.extract_strided_slice %52 {offsets = [0, 32], sizes = [2, 32], strides = [1, 1]} : vector<2x96xf32> to vector<2x32xf32>
    %57 = vector.extract_strided_slice %52 {offsets = [0, 64], sizes = [2, 32], strides = [1, 1]} : vector<2x96xf32> to vector<2x32xf32>
    %58 = arith.mulf %56, %43 : vector<2x32xf32>
    %59 = arith.mulf %55, %54 : vector<2x32xf32>
    %60 = arith.addf %58, %59 : vector<2x32xf32>
    %61 = math.tanh %60 : vector<2x32xf32>
    %62 = arith.mulf %57, %61 : vector<2x32xf32>
    %63 = vector.extract_strided_slice %7 {offsets = [2, 0], sizes = [2, 32], strides = [1, 1]} : vector<16x32xf32> to vector<2x32xf32>
    %64 = arith.mulf %63, %62 : vector<2x32xf32>
    %65 = vector.extract_strided_slice %64 {offsets = [0, 0], sizes = [2, 16], strides = [1, 1]} : vector<2x32xf32> to vector<2x16xf32>
    %c2 = arith.constant 2 : index
    %c0_19 = arith.constant 0 : index
    %66 = vector.load %arg12[%c2, %c0_19] : memref<16x32xf32, #tpu.memory_space<vmem>>, vector<2x16xf32>
    tpu.vector_store %arg12[%c2, %c0_19], %65 {strides = array<i32>} : memref<16x32xf32, #tpu.memory_space<vmem>>, vector<2x16xf32>,
    %67 = vector.extract_strided_slice %64 {offsets = [0, 16], sizes = [2, 16], strides = [1, 1]} : vector<2x32xf32> to vector<2x16xf32>
    %c12 = arith.constant 12 : index
    %c16_20 = arith.constant 16 : index
    %68 = vector.load %arg12[%c12, %c16_20] : memref<16x32xf32, #tpu.memory_space<vmem>>, vector<2x16xf32>
    tpu.vector_store %arg12[%c12, %c16_20], %67 {strides = array<i32>} : memref<16x32xf32, #tpu.memory_space<vmem>>, vector<2x16xf32>,
    %cst_21 = arith.constant 1.000000e+00 : f32
    %69 = vector.broadcast %cst_21 : f32 to vector<2x32xf32>
    %70 = arith.subf %69, %63 : vector<2x32xf32>
    %71 = arith.mulf %70, %38 : vector<2x32xf32>
    %72 = arith.addf %64, %71 : vector<2x32xf32>
    %73 = arith.mulf %63, %60 : vector<2x32xf32>
    %cst_22 = arith.constant 1.000000e+00 : f32
    %74 = vector.broadcast %cst_22 : f32 to vector<2x32xf32>
    %75 = arith.subf %74, %63 : vector<2x32xf32>
    %76 = arith.mulf %75, %43 : vector<2x32xf32>
    %77 = arith.addf %73, %76 : vector<2x32xf32>
    %78 = vector.extract_strided_slice %5 {offsets = [4, 0], sizes = [2, 128], strides = [1, 1]} : vector<16x128xf32> to vector<2x128xf32>
    %cst_23 = arith.constant dense<0.000000e+00> : vector<2x128xf32>
    %79 = tpu.matmul %72, %6, %cst_23 {dimension_numbers = #tpu.dot_dimension_numbers<[1], [0], [0], [1], [0, 0, 1, 1], [], []>} : vector<2x32xf32>, vector<32x128xf32>, vector<2x128xf32> -> vector<2x128xf32>
    %80 = arith.addf %78, %79 : vector<2x128xf32>
    %81 = vector.extract_strided_slice %80 {offsets = [0, 0], sizes = [2, 96], strides = [1, 1]} : vector<2x128xf32> to vector<2x96xf32>
    %82 = arith.negf %81 : vector<2x96xf32>
    %83 = math.exp %82 : vector<2x96xf32>
    %cst_24 = arith.constant 1.000000e+00 : f32
    %84 = vector.broadcast %cst_24 : f32 to vector<2x96xf32>
    %85 = arith.addf %84, %83 : vector<2x96xf32>
    %86 = arith.divf %84, %85 : vector<2x96xf32>
    %87 = vector.extract_strided_slice %80 {offsets = [0, 96], sizes = [2, 32], strides = [1, 1]} : vector<2x128xf32> to vector<2x32xf32>
    %88 = math.tanh %87 : vector<2x32xf32>
    %89 = vector.extract_strided_slice %86 {offsets = [0, 0], sizes = [2, 32], strides = [1, 1]} : vector<2x96xf32> to vector<2x32xf32>
    %90 = vector.extract_strided_slice %86 {offsets = [0, 32], sizes = [2, 32], strides = [1, 1]} : vector<2x96xf32> to vector<2x32xf32>
    %91 = vector.extract_strided_slice %86 {offsets = [0, 64], sizes = [2, 32], strides = [1, 1]} : vector<2x96xf32> to vector<2x32xf32>
    %92 = arith.mulf %90, %77 : vector<2x32xf32>
    %93 = arith.mulf %89, %88 : vector<2x32xf32>
    %94 = arith.addf %92, %93 : vector<2x32xf32>
    %95 = math.tanh %94 : vector<2x32xf32>
    %96 = arith.mulf %91, %95 : vector<2x32xf32>
    %97 = vector.extract_strided_slice %7 {offsets = [4, 0], sizes = [2, 32], strides = [1, 1]} : vector<16x32xf32> to vector<2x32xf32>
    %98 = arith.mulf %97, %96 : vector<2x32xf32>
    %99 = vector.extract_strided_slice %98 {offsets = [0, 0], sizes = [2, 16], strides = [1, 1]} : vector<2x32xf32> to vector<2x16xf32>
    %c4 = arith.constant 4 : index
    %c0_25 = arith.constant 0 : index
    %100 = vector.load %arg12[%c4, %c0_25] : memref<16x32xf32, #tpu.memory_space<vmem>>, vector<2x16xf32>
    tpu.vector_store %arg12[%c4, %c0_25], %99 {strides = array<i32>} : memref<16x32xf32, #tpu.memory_space<vmem>>, vector<2x16xf32>,
    %101 = vector.extract_strided_slice %98 {offsets = [0, 16], sizes = [2, 16], strides = [1, 1]} : vector<2x32xf32> to vector<2x16xf32>
    %c10 = arith.constant 10 : index
    %c16_26 = arith.constant 16 : index
    %102 = vector.load %arg12[%c10, %c16_26] : memref<16x32xf32, #tpu.memory_space<vmem>>, vector<2x16xf32>
    tpu.vector_store %arg12[%c10, %c16_26], %101 {strides = array<i32>} : memref<16x32xf32, #tpu.memory_space<vmem>>, vector<2x16xf32>,
    %cst_27 = arith.constant 1.000000e+00 : f32
    %103 = vector.broadcast %cst_27 : f32 to vector<2x32xf32>
    %104 = arith.subf %103, %97 : vector<2x32xf32>
    %105 = arith.mulf %104, %72 : vector<2x32xf32>
    %106 = arith.addf %98, %105 : vector<2x32xf32>
    %107 = arith.mulf %97, %94 : vector<2x32xf32>
    %cst_28 = arith.constant 1.000000e+00 : f32
    %108 = vector.broadcast %cst_28 : f32 to vector<2x32xf32>
    %109 = arith.subf %108, %97 : vector<2x32xf32>
    %110 = arith.mulf %109, %77 : vector<2x32xf32>
    %111 = arith.addf %107, %110 : vector<2x32xf32>
    %112 = vector.extract_strided_slice %5 {offsets = [6, 0], sizes = [2, 128], strides = [1, 1]} : vector<16x128xf32> to vector<2x128xf32>
    %cst_29 = arith.constant dense<0.000000e+00> : vector<2x128xf32>
    %113 = tpu.matmul %106, %6, %cst_29 {dimension_numbers = #tpu.dot_dimension_numbers<[1], [0], [0], [1], [0, 0, 1, 1], [], []>} : vector<2x32xf32>, vector<32x128xf32>, vector<2x128xf32> -> vector<2x128xf32>
    %114 = arith.addf %112, %113 : vector<2x128xf32>
    %115 = vector.extract_strided_slice %114 {offsets = [0, 0], sizes = [2, 96], strides = [1, 1]} : vector<2x128xf32> to vector<2x96xf32>
    %116 = arith.negf %115 : vector<2x96xf32>
    %117 = math.exp %116 : vector<2x96xf32>
    %cst_30 = arith.constant 1.000000e+00 : f32
    %118 = vector.broadcast %cst_30 : f32 to vector<2x96xf32>
    %119 = arith.addf %118, %117 : vector<2x96xf32>
    %120 = arith.divf %118, %119 : vector<2x96xf32>
    %121 = vector.extract_strided_slice %114 {offsets = [0, 96], sizes = [2, 32], strides = [1, 1]} : vector<2x128xf32> to vector<2x32xf32>
    %122 = math.tanh %121 : vector<2x32xf32>
    %123 = vector.extract_strided_slice %120 {offsets = [0, 0], sizes = [2, 32], strides = [1, 1]} : vector<2x96xf32> to vector<2x32xf32>
    %124 = vector.extract_strided_slice %120 {offsets = [0, 32], sizes = [2, 32], strides = [1, 1]} : vector<2x96xf32> to vector<2x32xf32>
    %125 = vector.extract_strided_slice %120 {offsets = [0, 64], sizes = [2, 32], strides = [1, 1]} : vector<2x96xf32> to vector<2x32xf32>
    %126 = arith.mulf %124, %111 : vector<2x32xf32>
    %127 = arith.mulf %123, %122 : vector<2x32xf32>
    %128 = arith.addf %126, %127 : vector<2x32xf32>
    %129 = math.tanh %128 : vector<2x32xf32>
    %130 = arith.mulf %125, %129 : vector<2x32xf32>
    %131 = vector.extract_strided_slice %7 {offsets = [6, 0], sizes = [2, 32], strides = [1, 1]} : vector<16x32xf32> to vector<2x32xf32>
    %132 = arith.mulf %131, %130 : vector<2x32xf32>
    %133 = vector.extract_strided_slice %132 {offsets = [0, 0], sizes = [2, 16], strides = [1, 1]} : vector<2x32xf32> to vector<2x16xf32>
    %c6 = arith.constant 6 : index
    %c0_31 = arith.constant 0 : index
    %134 = vector.load %arg12[%c6, %c0_31] : memref<16x32xf32, #tpu.memory_space<vmem>>, vector<2x16xf32>
    tpu.vector_store %arg12[%c6, %c0_31], %133 {strides = array<i32>} : memref<16x32xf32, #tpu.memory_space<vmem>>, vector<2x16xf32>,
    %135 = vector.extract_strided_slice %132 {offsets = [0, 16], sizes = [2, 16], strides = [1, 1]} : vector<2x32xf32> to vector<2x16xf32>
    %c8 = arith.constant 8 : index
    %c16_32 = arith.constant 16 : index
    %136 = vector.load %arg12[%c8, %c16_32] : memref<16x32xf32, #tpu.memory_space<vmem>>, vector<2x16xf32>
    tpu.vector_store %arg12[%c8, %c16_32], %135 {strides = array<i32>} : memref<16x32xf32, #tpu.memory_space<vmem>>, vector<2x16xf32>,
    %cst_33 = arith.constant 1.000000e+00 : f32
    %137 = vector.broadcast %cst_33 : f32 to vector<2x32xf32>
    %138 = arith.subf %137, %131 : vector<2x32xf32>
    %139 = arith.mulf %138, %106 : vector<2x32xf32>
    %140 = arith.addf %132, %139 : vector<2x32xf32>
    %141 = arith.mulf %131, %128 : vector<2x32xf32>
    %cst_34 = arith.constant 1.000000e+00 : f32
    %142 = vector.broadcast %cst_34 : f32 to vector<2x32xf32>
    %143 = arith.subf %142, %131 : vector<2x32xf32>
    %144 = arith.mulf %143, %111 : vector<2x32xf32>
    %145 = arith.addf %141, %144 : vector<2x32xf32>
    %146 = vector.extract_strided_slice %5 {offsets = [8, 0], sizes = [2, 128], strides = [1, 1]} : vector<16x128xf32> to vector<2x128xf32>
    %cst_35 = arith.constant dense<0.000000e+00> : vector<2x128xf32>
    %147 = tpu.matmul %140, %6, %cst_35 {dimension_numbers = #tpu.dot_dimension_numbers<[1], [0], [0], [1], [0, 0, 1, 1], [], []>} : vector<2x32xf32>, vector<32x128xf32>, vector<2x128xf32> -> vector<2x128xf32>
    %148 = arith.addf %146, %147 : vector<2x128xf32>
    %149 = vector.extract_strided_slice %148 {offsets = [0, 0], sizes = [2, 96], strides = [1, 1]} : vector<2x128xf32> to vector<2x96xf32>
    %150 = arith.negf %149 : vector<2x96xf32>
    %151 = math.exp %150 : vector<2x96xf32>
    %cst_36 = arith.constant 1.000000e+00 : f32
    %152 = vector.broadcast %cst_36 : f32 to vector<2x96xf32>
    %153 = arith.addf %152, %151 : vector<2x96xf32>
    %154 = arith.divf %152, %153 : vector<2x96xf32>
    %155 = vector.extract_strided_slice %148 {offsets = [0, 96], sizes = [2, 32], strides = [1, 1]} : vector<2x128xf32> to vector<2x32xf32>
    %156 = math.tanh %155 : vector<2x32xf32>
    %157 = vector.extract_strided_slice %154 {offsets = [0, 0], sizes = [2, 32], strides = [1, 1]} : vector<2x96xf32> to vector<2x32xf32>
    %158 = vector.extract_strided_slice %154 {offsets = [0, 32], sizes = [2, 32], strides = [1, 1]} : vector<2x96xf32> to vector<2x32xf32>
    %159 = vector.extract_strided_slice %154 {offsets = [0, 64], sizes = [2, 32], strides = [1, 1]} : vector<2x96xf32> to vector<2x32xf32>
    %160 = arith.mulf %158, %145 : vector<2x32xf32>
    %161 = arith.mulf %157, %156 : vector<2x32xf32>
    %162 = arith.addf %160, %161 : vector<2x32xf32>
    %163 = math.tanh %162 : vector<2x32xf32>
    %164 = arith.mulf %159, %163 : vector<2x32xf32>
    %165 = vector.extract_strided_slice %7 {offsets = [8, 0], sizes = [2, 32], strides = [1, 1]} : vector<16x32xf32> to vector<2x32xf32>
    %166 = arith.mulf %165, %164 : vector<2x32xf32>
    %167 = vector.extract_strided_slice %166 {offsets = [0, 0], sizes = [2, 16], strides = [1, 1]} : vector<2x32xf32> to vector<2x16xf32>
    %c8_37 = arith.constant 8 : index
    %c0_38 = arith.constant 0 : index
    %168 = vector.load %arg12[%c8_37, %c0_38] : memref<16x32xf32, #tpu.memory_space<vmem>>, vector<2x16xf32>
    tpu.vector_store %arg12[%c8_37, %c0_38], %167 {strides = array<i32>} : memref<16x32xf32, #tpu.memory_space<vmem>>, vector<2x16xf32>,
    %169 = vector.extract_strided_slice %166 {offsets = [0, 16], sizes = [2, 16], strides = [1, 1]} : vector<2x32xf32> to vector<2x16xf32>
    %c6_39 = arith.constant 6 : index
    %c16_40 = arith.constant 16 : index
    %170 = vector.load %arg12[%c6_39, %c16_40] : memref<16x32xf32, #tpu.memory_space<vmem>>, vector<2x16xf32>
    tpu.vector_store %arg12[%c6_39, %c16_40], %169 {strides = array<i32>} : memref<16x32xf32, #tpu.memory_space<vmem>>, vector<2x16xf32>,
    %cst_41 = arith.constant 1.000000e+00 : f32
    %171 = vector.broadcast %cst_41 : f32 to vector<2x32xf32>
    %172 = arith.subf %171, %165 : vector<2x32xf32>
    %173 = arith.mulf %172, %140 : vector<2x32xf32>
    %174 = arith.addf %166, %173 : vector<2x32xf32>
    %175 = arith.mulf %165, %162 : vector<2x32xf32>
    %cst_42 = arith.constant 1.000000e+00 : f32
    %176 = vector.broadcast %cst_42 : f32 to vector<2x32xf32>
    %177 = arith.subf %176, %165 : vector<2x32xf32>
    %178 = arith.mulf %177, %145 : vector<2x32xf32>
    %179 = arith.addf %175, %178 : vector<2x32xf32>
    %180 = vector.extract_strided_slice %5 {offsets = [10, 0], sizes = [2, 128], strides = [1, 1]} : vector<16x128xf32> to vector<2x128xf32>
    %cst_43 = arith.constant dense<0.000000e+00> : vector<2x128xf32>
    %181 = tpu.matmul %174, %6, %cst_43 {dimension_numbers = #tpu.dot_dimension_numbers<[1], [0], [0], [1], [0, 0, 1, 1], [], []>} : vector<2x32xf32>, vector<32x128xf32>, vector<2x128xf32> -> vector<2x128xf32>
    %182 = arith.addf %180, %181 : vector<2x128xf32>
    %183 = vector.extract_strided_slice %182 {offsets = [0, 0], sizes = [2, 96], strides = [1, 1]} : vector<2x128xf32> to vector<2x96xf32>
    %184 = arith.negf %183 : vector<2x96xf32>
    %185 = math.exp %184 : vector<2x96xf32>
    %cst_44 = arith.constant 1.000000e+00 : f32
    %186 = vector.broadcast %cst_44 : f32 to vector<2x96xf32>
    %187 = arith.addf %186, %185 : vector<2x96xf32>
    %188 = arith.divf %186, %187 : vector<2x96xf32>
    %189 = vector.extract_strided_slice %182 {offsets = [0, 96], sizes = [2, 32], strides = [1, 1]} : vector<2x128xf32> to vector<2x32xf32>
    %190 = math.tanh %189 : vector<2x32xf32>
    %191 = vector.extract_strided_slice %188 {offsets = [0, 0], sizes = [2, 32], strides = [1, 1]} : vector<2x96xf32> to vector<2x32xf32>
    %192 = vector.extract_strided_slice %188 {offsets = [0, 32], sizes = [2, 32], strides = [1, 1]} : vector<2x96xf32> to vector<2x32xf32>
    %193 = vector.extract_strided_slice %188 {offsets = [0, 64], sizes = [2, 32], strides = [1, 1]} : vector<2x96xf32> to vector<2x32xf32>
    %194 = arith.mulf %192, %179 : vector<2x32xf32>
    %195 = arith.mulf %191, %190 : vector<2x32xf32>
    %196 = arith.addf %194, %195 : vector<2x32xf32>
    %197 = math.tanh %196 : vector<2x32xf32>
    %198 = arith.mulf %193, %197 : vector<2x32xf32>
    %199 = vector.extract_strided_slice %7 {offsets = [10, 0], sizes = [2, 32], strides = [1, 1]} : vector<16x32xf32> to vector<2x32xf32>
    %200 = arith.mulf %199, %198 : vector<2x32xf32>
    %201 = vector.extract_strided_slice %200 {offsets = [0, 0], sizes = [2, 16], strides = [1, 1]} : vector<2x32xf32> to vector<2x16xf32>
    %c10_45 = arith.constant 10 : index
    %c0_46 = arith.constant 0 : index
    %202 = vector.load %arg12[%c10_45, %c0_46] : memref<16x32xf32, #tpu.memory_space<vmem>>, vector<2x16xf32>
    tpu.vector_store %arg12[%c10_45, %c0_46], %201 {strides = array<i32>} : memref<16x32xf32, #tpu.memory_space<vmem>>, vector<2x16xf32>,
    %203 = vector.extract_strided_slice %200 {offsets = [0, 16], sizes = [2, 16], strides = [1, 1]} : vector<2x32xf32> to vector<2x16xf32>
    %c4_47 = arith.constant 4 : index
    %c16_48 = arith.constant 16 : index
    %204 = vector.load %arg12[%c4_47, %c16_48] : memref<16x32xf32, #tpu.memory_space<vmem>>, vector<2x16xf32>
    tpu.vector_store %arg12[%c4_47, %c16_48], %203 {strides = array<i32>} : memref<16x32xf32, #tpu.memory_space<vmem>>, vector<2x16xf32>,
    %cst_49 = arith.constant 1.000000e+00 : f32
    %205 = vector.broadcast %cst_49 : f32 to vector<2x32xf32>
    %206 = arith.subf %205, %199 : vector<2x32xf32>
    %207 = arith.mulf %206, %174 : vector<2x32xf32>
    %208 = arith.addf %200, %207 : vector<2x32xf32>
    %209 = arith.mulf %199, %196 : vector<2x32xf32>
    %cst_50 = arith.constant 1.000000e+00 : f32
    %210 = vector.broadcast %cst_50 : f32 to vector<2x32xf32>
    %211 = arith.subf %210, %199 : vector<2x32xf32>
    %212 = arith.mulf %211, %179 : vector<2x32xf32>
    %213 = arith.addf %209, %212 : vector<2x32xf32>
    %214 = vector.extract_strided_slice %5 {offsets = [12, 0], sizes = [2, 128], strides = [1, 1]} : vector<16x128xf32> to vector<2x128xf32>
    %cst_51 = arith.constant dense<0.000000e+00> : vector<2x128xf32>
    %215 = tpu.matmul %208, %6, %cst_51 {dimension_numbers = #tpu.dot_dimension_numbers<[1], [0], [0], [1], [0, 0, 1, 1], [], []>} : vector<2x32xf32>, vector<32x128xf32>, vector<2x128xf32> -> vector<2x128xf32>
    %216 = arith.addf %214, %215 : vector<2x128xf32>
    %217 = vector.extract_strided_slice %216 {offsets = [0, 0], sizes = [2, 96], strides = [1, 1]} : vector<2x128xf32> to vector<2x96xf32>
    %218 = arith.negf %217 : vector<2x96xf32>
    %219 = math.exp %218 : vector<2x96xf32>
    %cst_52 = arith.constant 1.000000e+00 : f32
    %220 = vector.broadcast %cst_52 : f32 to vector<2x96xf32>
    %221 = arith.addf %220, %219 : vector<2x96xf32>
    %222 = arith.divf %220, %221 : vector<2x96xf32>
    %223 = vector.extract_strided_slice %216 {offsets = [0, 96], sizes = [2, 32], strides = [1, 1]} : vector<2x128xf32> to vector<2x32xf32>
    %224 = math.tanh %223 : vector<2x32xf32>
    %225 = vector.extract_strided_slice %222 {offsets = [0, 0], sizes = [2, 32], strides = [1, 1]} : vector<2x96xf32> to vector<2x32xf32>
    %226 = vector.extract_strided_slice %222 {offsets = [0, 32], sizes = [2, 32], strides = [1, 1]} : vector<2x96xf32> to vector<2x32xf32>
    %227 = vector.extract_strided_slice %222 {offsets = [0, 64], sizes = [2, 32], strides = [1, 1]} : vector<2x96xf32> to vector<2x32xf32>
    %228 = arith.mulf %226, %213 : vector<2x32xf32>
    %229 = arith.mulf %225, %224 : vector<2x32xf32>
    %230 = arith.addf %228, %229 : vector<2x32xf32>
    %231 = math.tanh %230 : vector<2x32xf32>
    %232 = arith.mulf %227, %231 : vector<2x32xf32>
    %233 = vector.extract_strided_slice %7 {offsets = [12, 0], sizes = [2, 32], strides = [1, 1]} : vector<16x32xf32> to vector<2x32xf32>
    %234 = arith.mulf %233, %232 : vector<2x32xf32>
    %235 = vector.extract_strided_slice %234 {offsets = [0, 0], sizes = [2, 16], strides = [1, 1]} : vector<2x32xf32> to vector<2x16xf32>
    %c12_53 = arith.constant 12 : index
    %c0_54 = arith.constant 0 : index
    %236 = vector.load %arg12[%c12_53, %c0_54] : memref<16x32xf32, #tpu.memory_space<vmem>>, vector<2x16xf32>
    tpu.vector_store %arg12[%c12_53, %c0_54], %235 {strides = array<i32>} : memref<16x32xf32, #tpu.memory_space<vmem>>, vector<2x16xf32>,
    %237 = vector.extract_strided_slice %234 {offsets = [0, 16], sizes = [2, 16], strides = [1, 1]} : vector<2x32xf32> to vector<2x16xf32>
    %c2_55 = arith.constant 2 : index
    %c16_56 = arith.constant 16 : index
    %238 = vector.load %arg12[%c2_55, %c16_56] : memref<16x32xf32, #tpu.memory_space<vmem>>, vector<2x16xf32>
    tpu.vector_store %arg12[%c2_55, %c16_56], %237 {strides = array<i32>} : memref<16x32xf32, #tpu.memory_space<vmem>>, vector<2x16xf32>,
    %cst_57 = arith.constant 1.000000e+00 : f32
    %239 = vector.broadcast %cst_57 : f32 to vector<2x32xf32>
    %240 = arith.subf %239, %233 : vector<2x32xf32>
    %241 = arith.mulf %240, %208 : vector<2x32xf32>
    %242 = arith.addf %234, %241 : vector<2x32xf32>
    %243 = arith.mulf %233, %230 : vector<2x32xf32>
    %cst_58 = arith.constant 1.000000e+00 : f32
    %244 = vector.broadcast %cst_58 : f32 to vector<2x32xf32>
    %245 = arith.subf %244, %233 : vector<2x32xf32>
    %246 = arith.mulf %245, %213 : vector<2x32xf32>
    %247 = arith.addf %243, %246 : vector<2x32xf32>
    %248 = vector.extract_strided_slice %5 {offsets = [14, 0], sizes = [2, 128], strides = [1, 1]} : vector<16x128xf32> to vector<2x128xf32>
    %cst_59 = arith.constant dense<0.000000e+00> : vector<2x128xf32>
    %249 = tpu.matmul %242, %6, %cst_59 {dimension_numbers = #tpu.dot_dimension_numbers<[1], [0], [0], [1], [0, 0, 1, 1], [], []>} : vector<2x32xf32>, vector<32x128xf32>, vector<2x128xf32> -> vector<2x128xf32>
    %250 = arith.addf %248, %249 : vector<2x128xf32>
    %251 = vector.extract_strided_slice %250 {offsets = [0, 0], sizes = [2, 96], strides = [1, 1]} : vector<2x128xf32> to vector<2x96xf32>
    %252 = arith.negf %251 : vector<2x96xf32>
    %253 = math.exp %252 : vector<2x96xf32>
    %cst_60 = arith.constant 1.000000e+00 : f32
    %254 = vector.broadcast %cst_60 : f32 to vector<2x96xf32>
    %255 = arith.addf %254, %253 : vector<2x96xf32>
    %256 = arith.divf %254, %255 : vector<2x96xf32>
    %257 = vector.extract_strided_slice %250 {offsets = [0, 96], sizes = [2, 32], strides = [1, 1]} : vector<2x128xf32> to vector<2x32xf32>
    %258 = math.tanh %257 : vector<2x32xf32>
    %259 = vector.extract_strided_slice %256 {offsets = [0, 0], sizes = [2, 32], strides = [1, 1]} : vector<2x96xf32> to vector<2x32xf32>
    %260 = vector.extract_strided_slice %256 {offsets = [0, 32], sizes = [2, 32], strides = [1, 1]} : vector<2x96xf32> to vector<2x32xf32>
    %261 = vector.extract_strided_slice %256 {offsets = [0, 64], sizes = [2, 32], strides = [1, 1]} : vector<2x96xf32> to vector<2x32xf32>
    %262 = arith.mulf %260, %247 : vector<2x32xf32>
    %263 = arith.mulf %259, %258 : vector<2x32xf32>
    %264 = arith.addf %262, %263 : vector<2x32xf32>
    %265 = math.tanh %264 : vector<2x32xf32>
    %266 = arith.mulf %261, %265 : vector<2x32xf32>
    %267 = vector.extract_strided_slice %7 {offsets = [14, 0], sizes = [2, 32], strides = [1, 1]} : vector<16x32xf32> to vector<2x32xf32>
    %268 = arith.mulf %267, %266 : vector<2x32xf32>
    %269 = vector.extract_strided_slice %268 {offsets = [0, 0], sizes = [2, 16], strides = [1, 1]} : vector<2x32xf32> to vector<2x16xf32>
    %c14_61 = arith.constant 14 : index
    %c0_62 = arith.constant 0 : index
    %270 = vector.load %arg12[%c14_61, %c0_62] : memref<16x32xf32, #tpu.memory_space<vmem>>, vector<2x16xf32>
    tpu.vector_store %arg12[%c14_61, %c0_62], %269 {strides = array<i32>} : memref<16x32xf32, #tpu.memory_space<vmem>>, vector<2x16xf32>,
    %271 = vector.extract_strided_slice %268 {offsets = [0, 16], sizes = [2, 16], strides = [1, 1]} : vector<2x32xf32> to vector<2x16xf32>
    %c0_63 = arith.constant 0 : index
    %c16_64 = arith.constant 16 : index
    %272 = vector.load %arg12[%c0_63, %c16_64] : memref<16x32xf32, #tpu.memory_space<vmem>>, vector<2x16xf32>
    tpu.vector_store %arg12[%c0_63, %c16_64], %271 {strides = array<i32>} : memref<16x32xf32, #tpu.memory_space<vmem>>, vector<2x16xf32>,
    %c0_65 = arith.constant 0 : index
    %c0_66 = arith.constant 0 : index
    %273 = vector.load %arg12[%c0_65, %c0_66] : memref<16x32xf32, #tpu.memory_space<vmem>>, vector<16x32xf32>
    %c0_67 = arith.constant 0 : index
    %c0_68 = arith.constant 0 : index
    %274 = vector.load %arg5[%c0_67, %c0_68] : memref<16x1xf32, #tpu.memory_space<vmem>>, vector<16x1xf32>
    %275 = vector.broadcast %274 : vector<16x1xf32> to vector<16x32xf32>
    %276 = arith.mulf %275, %273 : vector<16x32xf32>
    %cst_69 = arith.constant 0.000000e+00 : f32
    %277 = vector.broadcast %cst_69 : f32 to vector<2x32xf32>
    %278 = vector.extract_strided_slice %276 {offsets = [0, 0], sizes = [14, 32], strides = [1, 1]} : vector<16x32xf32> to vector<14x32xf32>
    %279 = tpu.concatenate %277, %278 in 0 : vector<2x32xf32>, vector<14x32xf32> -> vector<16x32xf32>
    %280 = vector.extract_strided_slice %276 {offsets = [2, 0], sizes = [14, 32], strides = [1, 1]} : vector<16x32xf32> to vector<14x32xf32>
    %281 = tpu.concatenate %280, %277 in 0 : vector<14x32xf32>, vector<2x32xf32> -> vector<16x32xf32>
    %282 = tpu.concatenate %279, %276, %281 in 1 : vector<16x32xf32>, vector<16x32xf32>, vector<16x32xf32> -> vector<16x96xf32>
    %c0_70 = arith.constant 0 : index
    %c0_71 = arith.constant 0 : index
    %283 = vector.load %arg7[%c0_70, %c0_71] : memref<96x32xf32, #tpu.memory_space<vmem>>, vector<96x32xf32>
    %cst_72 = arith.constant dense<0.000000e+00> : vector<16x32xf32>
    %284 = tpu.matmul %282, %283, %cst_72 {dimension_numbers = #tpu.dot_dimension_numbers<[1], [0], [0], [1], [0, 0, 1, 1], [], []>} : vector<16x96xf32>, vector<96x32xf32>, vector<16x32xf32> -> vector<16x32xf32>
    %c0_73 = arith.constant 0 : index
    %c0_74 = arith.constant 0 : index
    %285 = vector.load %arg8[%c0_73, %c0_74] : memref<1x32xf32, #tpu.memory_space<vmem>>, vector<1x32xf32>
    %286 = vector.broadcast %285 : vector<1x32xf32> to vector<16x32xf32>
    %287 = arith.addf %284, %286 : vector<16x32xf32>
    %cst_75 = arith.constant 0.000000e+00 : f32
    %288 = vector.broadcast %cst_75 : f32 to vector<16x32xf32>
    %289 = arith.maximumf %287, %288 : vector<16x32xf32>
    %c0_76 = arith.constant 0 : index
    %c0_77 = arith.constant 0 : index
    %290 = vector.load %arg6[%c0_76, %c0_77] : memref<16x1xf32, #tpu.memory_space<vmem>>, vector<16x1xf32>
    %291 = vector.broadcast %290 : vector<16x1xf32> to vector<16x32xf32>
    %292 = arith.mulf %289, %291 : vector<16x32xf32>
    %293 = vector.shape_cast %292 : vector<16x32xf32> to vector<8x2x32xf32>
    %cst_78 = arith.constant dense<0xFF800000> : vector<2x32xf32>
    %294 = vector.multi_reduction <maximumf>, %293, %cst_78 [0] : vector<8x2x32xf32> to vector<2x32xf32>
    %c0_79 = arith.constant 0 : index
    %c0_80 = arith.constant 0 : index
    %295 = vector.load %arg9[%c0_79, %c0_80] : memref<32x128xf32, #tpu.memory_space<vmem>>, vector<32x128xf32>
    %cst_81 = arith.constant dense<0.000000e+00> : vector<2x128xf32>
    %296 = tpu.matmul %294, %295, %cst_81 {dimension_numbers = #tpu.dot_dimension_numbers<[1], [0], [0], [1], [0, 0, 1, 1], [], []>} : vector<2x32xf32>, vector<32x128xf32>, vector<2x128xf32> -> vector<2x128xf32>
    %c0_82 = arith.constant 0 : index
    %c0_83 = arith.constant 0 : index
    %297 = vector.load %arg10[%c0_82, %c0_83] : memref<1x128xf32, #tpu.memory_space<vmem>>, vector<1x128xf32>
    %298 = vector.broadcast %297 : vector<1x128xf32> to vector<2x128xf32>
    %299 = arith.addf %296, %298 : vector<2x128xf32>
    %c0_84 = arith.constant 0 : index
    %c0_85 = arith.constant 0 : index
    %300 = vector.load %arg11[%c0_84, %c0_85] : memref<2x128xf32, #tpu.memory_space<vmem>>, vector<2x128xf32>
    tpu.vector_store %arg11[%c0_84, %c0_85], %299 {strides = array<i32>} : memref<2x128xf32, #tpu.memory_space<vmem>>, vector<2x128xf32>,
    return
  }
}

</mosaic_0001>

<bundles_post_ra>
// kernel: tpu_custom_call.1
= control target key start
LH: loop header
LB: loop body
LE: loop exit
PB: predicated region body
PF: predicated region fallthrough
CT: control target
= control target key end

     0   :  { %16 = vsyncpa [#allocation4], 0  ;;  %s2278_s0 = inlined_call_operand.hbm [shape: f32[16,64], index: 0, kind: input, shape index: {}]   ;;  %s2279_s1 = inlined_call_operand.vmem [shape: f32[64,128], index: 1, kind: input, shape index: {}]   ;;  %s2280_s2 = inlined_call_operand.vmem [shape: f32[32,128], index: 2, kind: input, shape index: {}]   ;;  %s2281_s3 = inlined_call_operand.vmem [shape: f32[1,128], index: 3, kind: input, shape index: {}]   ;;  %s2282_s4 = inlined_call_operand.hbm [shape: f32[16,32], index: 4, kind: input, shape index: {}]   ;;  %s2283_s5 = inlined_call_operand.vmem [shape: f32[16,1], index: 5, kind: input, shape index: {}]   ;;  %s2284_s6 = inlined_call_operand.vmem [shape: f32[16,1], index: 6, kind: input, shape index: {}]   ;;  %s2285_s7 = inlined_call_operand.vmem [shape: f32[96,32], index: 7, kind: input, shape index: {}]   ;;  %s2286_s8 = inlined_call_operand.vmem [shape: f32[1,32], index: 8, kind: input, shape index: {}]   ;;  %s2287_s9 = inlined_call_operand.vmem [shape: f32[32,128], index: 9, kind: input, shape index: {}]   ;;  %s2288_s10 = inlined_call_operand.vmem [shape: f32[1,128], index: 10, kind: input, shape index: {}]   ;;  %s2289_s11 = inlined_call_operand.hbm [shape: f32[2,128], index: 11, kind: output, shape index: {}]  }
   0x1   :  { %17 = vsyncpa [#allocation7], 0 }
   0x2   :  { %18 = vsyncpa [#allocation5], 0  ;;  %s1867_s17 = smov [#allocation3]  }
   0x3   :  { %s24_s18 = sshll.u32 %s1867_s17, 4  ;;  %s25_s18 = int_to_ptr.vmem [resolvable:$true] %s24_s18 }
   0x4   :  { %s1809_s19 = scalar_lea.vmem %s25_s18, 256  ;;  %p1814_p1 = scmp.lt.s32.totalorder %s25_s18, %s25_s18 }
   0x5   :  { %p1810_p0 = scmp.ne.s32.totalorder %s25_s18, %s1809_s19  ;;  %p1815_p2 = scmp.lt.s32.totalorder %s1809_s19, %s1809_s19 }
   0x7   :  { %p1816_p3 = por %p1815_p2, %p1814_p1 }
   0x9   :  { %p1817_p4 = pnand %p1816_p3, %p1810_p0 }
   0xb   :  { %1820 = shalt.err (!%p1817_p4)
}
   0xc   :  { %s1868_s20 = smov 128   ;;  %s1869_s21 = smov 8  }
   0xd   :  { %30 = dma.hbm_to_vmem [thread:$0]  %s2278_s0, 256, %s25_s18, [#allocation4], %s1868_s20, %s1868_s20, %s1869_s21  }
   0xe   :  { %s1870_s24 = smov [#allocation6]  }
   0xf   :  { %s42_s25 = sshll.u32 %s1870_s24, 4  ;;  %s43_s25 = int_to_ptr.vmem [resolvable:$true] %s42_s25 }
  0x10   :  { %s1829_s26 = scalar_lea.vmem %s43_s25, 256  ;;  %p1834_p6 = scmp.lt.s32.totalorder %s43_s25, %s43_s25 }
  0x11   :  { %p1830_p5 = scmp.ne.s32.totalorder %s43_s25, %s1829_s26  ;;  %p1835_p7 = scmp.lt.s32.totalorder %s1829_s26, %s1829_s26 }
  0x13   :  { %p1836_p8 = por %p1835_p7, %p1834_p6 }
  0x15   :  { %p1837_p9 = pnand %p1836_p8, %p1830_p5 }
  0x17   :  { %1840 = shalt.err (!%p1837_p9)
}
  0x18   :  { %48 = dma.hbm_to_vmem [thread:$0]  %s2282_s4, 256, %s43_s25, [#allocation7], %s1868_s20, %s1868_s20, %s1869_s21  }
  0x19   :  { %1861 = dma.done.wait [#allocation4], 256  }
  0x1a   :  { %1862 = vsyncadd [#allocation4], 4294967040 }
  0x1b   :  { %1863 = dma.done.wait [#allocation7], 256  }
  0x1c   :  { %1864 = vsyncadd [#allocation7], 4294967040  ;;  %v1871_v0 = vmov 0.0   ;;  %vm1872_vm0 = vmmov 0   ;;  %v76_v1 = vld [vmem:[%s2279_s1 + $0x38] sm:$0xff]  ;;  %v75_v2 = vld [vmem:[%s2279_s1 + $0x30] sm:$0xff] }
  0x1d   :  { %1597 = vmatprep.subr.mxu1 %v1871_v0  ;;  %1605 = vmatprep.mubr.msk.f32.mxu1 %vm1872_vm0, %v1871_v0  ;;  %v74_v3 = vld [vmem:[%s2279_s1 + $0x28] sm:$0xff]  ;;  %v1960_v4 = vld [vmem:[%s2280_s2 + $0x18] sm:$0xff]  ;;  %v1965_v5 = vld [vmem:[%s2280_s2 + $0x10] sm:$0xff]  ;;  %vm84_vm1 = vcmask 523264   ;;  %s1873_s12 = smov 32   ;;  %s1875_s4 = smov 64  }
  0x1e   :  { %1578 = vmatprep.subr.mxu0 %v76_v1  ;;  %1598 = vmatpush3.msra.mxu1 %v1960_v4  ;;  %v73_v6 = vld [vmem:[%s2279_s1 + $0x20] sm:$0xff]  ;;  %v67_v7 = vld [vmem:[#allocation3] sm:$0xff]  ;;  %v1976_v8 = vld [vmem:[%s2280_s2 + $0x8] sm:$0xff]  ;;  %vm276_vm2 = vcmask 123904   ;;  %vm278_vm3 = vcmask 255104   ;;  %vm172_vm4 = vcmask 261120  }
  0x1f   :  { %1579 = vmatpush3.msra.mxu0 %v76_v1  ;;  %1599 = vmatprep.subr.mxu1 %v1871_v0  ;;  %v72_v9 = vld [vmem:[%s2279_s1 + $0x18] sm:$0xff]  ;;  %v1986_v10 = vld [vmem:[%s2280_s2] sm:$0xff]  ;;  %v71_v11 = vld [vmem:[%s2279_s1 + $0x10] sm:$0xff]  ;;  %vm400_vm5 = vcmask 125954   ;;  %vm402_vm6 = vcmask 257154   ;;  %vm528_vm7 = vcmask 128004  }
  0x20   :  { %1580 = vmatprep.subr.mxu0 %v75_v2  ;;  %1600 = vmatpush3.msra.mxu1 %v1965_v5  ;;  %v70_v12 = vld [vmem:[%s2279_s1 + $0x8] sm:$0xff]  ;;  %v69_v13 = vld [vmem:[%s2279_s1] sm:$0xff]  ;;  %v68_v14 = vld [vmem:[#allocation3 + $0x8] sm:$0xff]  ;;  %vm530_vm8 = vcmask 259204   ;;  %vm656_vm9 = vcmask 130054   ;;  %vm658_vm10 = vcmask 261254  }
  0x21   :  { %1581 = vmatpush3.msra.mxu0 %v75_v2  ;;  %1601 = vmatprep.subr.mxu1 %v1871_v0  ;;  %v1486_v17 = vld [vmem:[%s2281_s3] ss:$0 sm:$0xff]  ;;  %s1874_s3 = smov 96   ;;  %vm1185_vm11 = vcmask 1045504   ;;  %vm1178_vm12 = vcmask 1041408   ;;  %vm1227_vm13 = vcmask 785408  }
  0x22   :  { %1582 = vmatprep.subr.mxu0 %v74_v3  ;;  %1594 = vmatprep.mubr.msk.f32.mxu0 %vm84_vm1, %v67_v7  ;;  %v2036_v34 = vld [vmem:[#allocation6] sm:$0xff]  ;;  %vm1369_vm14 = vcmask 254976   ;;  %s1878_s27 = smov [#allocation8]  }
  0x23   :  { %1583 = vmatpush3.msra.mxu0 %v74_v3  ;;  %1602 = vmatpush3.msra.mxu1 %v1976_v8  ;;  %v2039_v35 = vsub.f32 1.0, %v2036_v34  ;;  %s1476_s28 = sshll.u32 %s1878_s27, 4  ;;  %s1477_s28 = int_to_ptr.vmem [resolvable:$true] %s1476_s28 }
  0x24   :  { %1584 = vmatprep.subr.mxu0 %v73_v6  ;;  %1603 = vmatprep.subr.mxu1 %v1871_v0  ;;  %s1841_s0 = scalar_lea.vmem %s1477_s28, 32  ;;  %p1846_p11 = scmp.lt.s32.totalorder %s1477_s28, %s1477_s28 }
  0x25   :  { %1585 = vmatpush3.msra.mxu0 %v73_v6  ;;  %1604 = vmatpush3.msra.mxu1 %v1986_v10  ;;  %v281_v36 = vmul.f32 0.0, %v2039_v35  ;;  %p1842_p10 = scmp.ne.s32.totalorder %s1477_s28, %s1841_s0  ;;  %p1847_p12 = scmp.lt.s32.totalorder %s1841_s0, %s1841_s0 }
  0x26   :  { %1586 = vmatprep.subr.mxu0 %v72_v9  ;;  %1606 = vmatmul.mubr.f32.vlgmr.msra.gmra.mxu1 %v1871_v0 }
  0x27   :  { %1587 = vmatpush3.msra.mxu0 %v72_v9  ;;  %1608 = vmatprep.subr.mxu1 %v1871_v0  ;;  %p1848_p13 = por %p1847_p12, %p1846_p11 }
  0x28   :  { %1588 = vmatprep.subr.mxu0 %v71_v11  ;;  %1609 = vmatpush3.msra.mxu1 %v1960_v4 }
  0x29   :  { %1589 = vmatpush3.msra.mxu0 %v71_v11  ;;  %1610 = vmatprep.subr.mxu1 %v1871_v0  ;;  %p1849_p0 = pnand %p1848_p13, %p1842_p10 }
  0x2a   :  { %1590 = vmatprep.subr.mxu0 %v70_v12  ;;  %1611 = vmatpush3.msra.mxu1 %v1965_v5 }
  0x2b   :  { %1591 = vmatpush3.msra.mxu0 %v70_v12  ;;  %1612 = vmatprep.subr.mxu1 %v1871_v0 }
  0x2c   :  { %1592 = vmatprep.subr.mxu0 %v69_v13  ;;  %1613 = vmatpush3.msra.mxu1 %v1976_v8 }
  0x2d   :  { %1593 = vmatpush3.msra.mxu0 %v69_v13  ;;  %1614 = vmatprep.subr.mxu1 %v1871_v0 }
  0x2e   :  { %1595 = vmatmul.mubr.msk.f32.vlgmr.msra.gmra.mxu0 %vm84_vm1, %v68_v14  ;;  %1616 = vmatprep.mubr.msk.f32.mxu1 %vm1872_vm0, %v1871_v0 }
  0x2f   :  { %1615 = vmatpush3.msra.mxu1 %v1986_v10  ;;  %1641 = vmatprep.subr.mxu0 %v1871_v0 }
  0x30   :  { %1619 = vmatprep.subr.mxu1 %v1871_v0  ;;  %1642 = vmatpush3.msra.mxu0 %v1960_v4 }
  0x31   :  { %1643 = vmatprep.subr.mxu0 %v1871_v0  ;;  %1649 = vmatprep.mubr.msk.f32.mxu0 %vm1872_vm0, %v1871_v0 }
  0x32   :  { %1644 = vmatpush3.msra.mxu0 %v1965_v5 }
  0x33   :  { %1645 = vmatprep.subr.mxu0 %v1871_v0 }
  0x34   :  { %1646 = vmatpush3.msra.mxu0 %v1976_v8 }
  0x35   :  { %1647 = vmatprep.subr.mxu0 %v1871_v0 }
  0x36   :  { %1648 = vmatpush3.msra.mxu0 %v1986_v10 }
  0x37   :  { %1663 = vmatprep.subr.mxu0 %v1871_v0 }
  0xe6   :  { %v242_v15 = vpop.f32.mrf.mxu1 }
  0xe8   :  { %v1607_v16 = vpop.f32.mrf.mxu1 }
  0xee   :  { %v1596_v18 = vpop.f32.mrf.mxu0 }
  0xef   :  { %v2027_v19 = vadd.f32 %v1596_v18, %v1486_v17 }
  0xf0   :  { %v157_v20 = vpop.f32.mrf.mxu0 }
  0xf1   :  { %v2029_v21 = vadd.f32 %v1486_v17, %v157_v20 }
  0xf3   :  { %v246_v22 = vadd.f32 %v242_v15, %v2029_v21 }
  0xf5   :  { %1737 = vtanh.f32 %v246_v22  ;;  %v1489_v24 = vmul.f32 -1.442695, %v246_v22 }
  0xf7   :  { %1739 = vpow2.f32 %v1489_v24 }
 0x102   :  { %v1738_v23 = vpop.eup %1737 }
 0x103   :  { %256 = vrot.lane.b32.xlu0 %v1738_v23, %s1873_s12 }
 0x104   :  { %v1740_v25 = vpop.eup %1739 }
 0x105   :  { %v250_v26 = vadd.f32 1.0, %v1740_v25 }
 0x107   :  { %1741 = vrcp.f32 %v250_v26 }
 0x114   :  { %v1742_v27 = vpop.eup %1741 }
 0x115   :  { %v254_v30 = vmul.f32 0.0, %v1742_v27 }
 0x175   :  { %v257_v28 = vpop.permute.xlu0 %256 }
 0x176   :  { %v259_v29 = vmul.f32 %v1742_v27, %v257_v28 }
 0x178   :  { %261 = vrot.lane.b32.xlu0 %v259_v29, %s1873_s12 }
 0x1ea   :  { %v262_v31 = vpop.permute.xlu0 %261 }
 0x1eb   :  { %v264_v32 = vadd.f32 %v262_v31, %v254_v30 }
 0x1ed   :  { %1743 = vtanh.f32 %v264_v32  ;;  %284 = vrot.lane.b32.xlu0 %v264_v32, %s1874_s3 }
 0x1fa   :  { %v1744_v33 = vpop.eup %1743 }
 0x1fb   :  { %267 = vrot.lane.b32.xlu1 %v1744_v33, %s1873_s12 }
 0x25f   :  { %v285_v37 = vpop.permute.xlu0 %284 }
 0x260   :  { %v287_v38 = vmul.f32 %v285_v37, %v2036_v34 }
 0x262   :  { %v288_v39 = vadd.f32 %v287_v38, %v281_v36 }
 0x264   :  { %v374_v40 = vrot.slane %v288_v39, 6 }
 0x266   :  { %375 = vrot.lane.b32.xlu0 %v374_v40, %s1873_s12  ;;  %v414_v2 = vmul.f32 %v374_v40, %v2039_v35 }
 0x26d   :  { %v268_v41 = vpop.permute.xlu1 %267 }
 0x26e   :  { %v270_v42 = vmul.f32 %v1742_v27, %v268_v41 }
 0x270   :  { %272 = vrot.lane.b32.xlu1 %v270_v42, %s1875_s4 }
 0x2d8   :  { %v376_v57 = vpop.permute.xlu0 %375 }
 0x2e2   :  { %v273_v43 = vpop.permute.xlu1 %272 }
 0x2e3   :  { %v275_v44 = vmul.f32 %v273_v43, %v2036_v34 }
 0x2e5   :  { %277 = vst.msk [vmem:[#allocation2] sm:$0x3] %vm276_vm2, %v275_v44  ;;  %v282_v45 = vadd.f32 %v281_v36, %v275_v44 }
 0x2e6   :  { %279 = vst.msk [vmem:[#allocation2 + $0xe] sm:$0x3] %vm278_vm3, %v275_v44 }
 0x2e7   :  { %1617 = vmatmul.mubr.msk.f32.vlgmr.msra.gmra.mxu1 %vm172_vm4, %v282_v45  ;;  %v404_v9 = vrot.slane %v282_v45, 6 }
 0x2e8   :  { %1620 = vmatpush3.msra.mxu1 %v1960_v4  ;;  %1627 = vmatprep.mubr.msk.f32.mxu1 %vm1872_vm0, %v1871_v0 }
 0x2e9   :  { %1621 = vmatprep.subr.mxu1 %v1871_v0  ;;  %v406_v12 = vmul.f32 %v404_v9, %v2039_v35 }
 0x2ea   :  { %1622 = vmatpush3.msra.mxu1 %v1965_v5 }
 0x2eb   :  { %1623 = vmatprep.subr.mxu1 %v1871_v0 }
 0x2ec   :  { %1624 = vmatpush3.msra.mxu1 %v1976_v8 }
 0x2ed   :  { %1625 = vmatprep.subr.mxu1 %v1871_v0 }
 0x2ee   :  { %1626 = vmatpush3.msra.mxu1 %v1986_v10 }
 0x2ef   :  { %1630 = vmatprep.subr.mxu1 %v1871_v0 }
 0x3a7   :  { %v358_v46 = vpop.f32.mrf.mxu1 }
 0x3a8   :  { %v363_v47 = vrot.slane %v358_v46, 6 }
 0x3a9   :  { %v1618_v48 = vpop.f32.mrf.mxu1 }
 0x3aa   :  { %v365_v49 = vadd.f32 %v363_v47, %v2029_v21 }
 0x3ac   :  { %1745 = vtanh.f32 %v365_v49  ;;  %v1491_v51 = vmul.f32 -1.442695, %v365_v49 }
 0x3ae   :  { %1747 = vpow2.f32 %v1491_v51 }
 0x3b9   :  { %v1746_v50 = vpop.eup %1745 }
 0x3ba   :  { %380 = vrot.lane.b32.xlu1 %v1746_v50, %s1873_s12 }
 0x3bb   :  { %v1748_v52 = vpop.eup %1747 }
 0x3bc   :  { %v369_v53 = vadd.f32 1.0, %v1748_v52 }
 0x3be   :  { %1749 = vrcp.f32 %v369_v53 }
 0x3cb   :  { %v1750_v54 = vpop.eup %1749 }
 0x3cc   :  { %v378_v58 = vmul.f32 %v1750_v54, %v376_v57 }
 0x42c   :  { %v381_v55 = vpop.permute.xlu1 %380 }
 0x42d   :  { %v383_v56 = vmul.f32 %v1750_v54, %v381_v55 }
 0x42f   :  { %385 = vrot.lane.b32.xlu1 %v383_v56, %s1873_s12 }
 0x4a1   :  { %v386_v59 = vpop.permute.xlu1 %385 }
 0x4a2   :  { %v388_v60 = vadd.f32 %v386_v59, %v378_v58 }
 0x4a4   :  { %1751 = vtanh.f32 %v388_v60 }
 0x4b1   :  { %v1752_v61 = vpop.eup %1751 }
 0x4b2   :  { %391 = vrot.lane.b32.xlu0 %v1752_v61, %s1873_s12 }
 0x4b6   :  { %409 = vrot.lane.b32.xlu0 %v388_v60, %s1874_s3 }
 0x524   :  { %v392_v62 = vpop.permute.xlu0 %391 }
 0x525   :  { %v394_v63 = vmul.f32 %v1750_v54, %v392_v62 }
 0x527   :  { %396 = vrot.lane.b32.xlu1 %v394_v63, %s1875_s4 }
 0x528   :  { %v410_v1 = vpop.permute.xlu0 %409 }
 0x529   :  { %v412_v3 = vmul.f32 %v410_v1, %v2036_v34 }
 0x52b   :  { %v415_v6 = vadd.f32 %v414_v2, %v412_v3 }
 0x52d   :  { %v502_v7 = vrot.slane %v415_v6, 6 }
 0x52f   :  { %503 = vrot.lane.b32.xlu0 %v502_v7, %s1873_s12  ;;  %v542_v39 = vmul.f32 %v502_v7, %v2039_v35 }
 0x599   :  { %v397_v11 = vpop.permute.xlu1 %396 }
 0x59a   :  { %v399_v13 = vmul.f32 %v397_v11, %v2036_v34 }
 0x59c   :  { %401 = vst.msk [vmem:[#allocation2] sm:$0xc] %vm400_vm5, %v399_v13  ;;  %v407_v14 = vadd.f32 %v406_v12, %v399_v13 }
 0x59d   :  { %403 = vst.msk [vmem:[#allocation2 + $0xa] sm:$0xc] %vm402_vm6, %v399_v13 }
 0x59e   :  { %v417_v15 = vrot.slane %v407_v14, 2  ;;  %v532_v43 = vrot.slane %v407_v14, 6 }
 0x5a0   :  { %1628 = vmatmul.mubr.msk.f32.vlgmr.msra.gmra.mxu1 %vm172_vm4, %v417_v15  ;;  %v534_v45 = vmul.f32 %v532_v43, %v2039_v35 }
 0x5a1   :  { %1631 = vmatpush3.msra.mxu1 %v1960_v4  ;;  %1638 = vmatprep.mubr.msk.f32.mxu1 %vm1872_vm0, %v1871_v0  ;;  %v504_v29 = vpop.permute.xlu0 %503 }
 0x5a2   :  { %1632 = vmatprep.subr.mxu1 %v1871_v0 }
 0x5a3   :  { %1633 = vmatpush3.msra.mxu1 %v1965_v5 }
 0x5a4   :  { %1634 = vmatprep.subr.mxu1 %v1871_v0 }
 0x5a5   :  { %1635 = vmatpush3.msra.mxu1 %v1976_v8 }
 0x5a6   :  { %1636 = vmatprep.subr.mxu1 %v1871_v0 }
 0x5a7   :  { %1637 = vmatpush3.msra.mxu1 %v1986_v10 }
 0x5a8   :  { %1652 = vmatprep.subr.mxu1 %v1871_v0 }
 0x660   :  { %v486_v16 = vpop.f32.mrf.mxu1 }
 0x661   :  { %v491_v17 = vrot.slane %v486_v16, 4 }
 0x662   :  { %v1629_v18 = vpop.f32.mrf.mxu1 }
 0x663   :  { %v493_v20 = vadd.f32 %v491_v17, %v2029_v21 }
 0x665   :  { %1753 = vtanh.f32 %v493_v20  ;;  %v1493_v23 = vmul.f32 -1.442695, %v493_v20 }
 0x667   :  { %1755 = vpow2.f32 %v1493_v23 }
 0x672   :  { %v1754_v22 = vpop.eup %1753 }
 0x673   :  { %508 = vrot.lane.b32.xlu1 %v1754_v22, %s1873_s12 }
 0x674   :  { %v1756_v24 = vpop.eup %1755 }
 0x675   :  { %v497_v25 = vadd.f32 1.0, %v1756_v24 }
 0x677   :  { %1757 = vrcp.f32 %v497_v25 }
 0x684   :  { %v1758_v26 = vpop.eup %1757 }
 0x685   :  { %v506_v30 = vmul.f32 %v1758_v26, %v504_v29 }
 0x6e5   :  { %v509_v27 = vpop.permute.xlu1 %508 }
 0x6e6   :  { %v511_v28 = vmul.f32 %v1758_v26, %v509_v27 }
 0x6e8   :  { %513 = vrot.lane.b32.xlu1 %v511_v28, %s1873_s12 }
 0x75a   :  { %v514_v31 = vpop.permute.xlu1 %513 }
 0x75b   :  { %v516_v32 = vadd.f32 %v514_v31, %v506_v30 }
 0x75d   :  { %1759 = vtanh.f32 %v516_v32 }
 0x76a   :  { %v1760_v33 = vpop.eup %1759 }
 0x76b   :  { %519 = vrot.lane.b32.xlu0 %v1760_v33, %s1873_s12  ;;  %v2135_v33 = vld [vmem:[#allocation6 + $0x8] sm:$0xff] }
 0x76f   :  { %537 = vrot.lane.b32.xlu0 %v516_v32, %s1874_s3 }
 0x7dd   :  { %v520_v36 = vpop.permute.xlu0 %519 }
 0x7de   :  { %v522_v37 = vmul.f32 %v1758_v26, %v520_v36 }
 0x7e0   :  { %524 = vrot.lane.b32.xlu1 %v522_v37, %s1875_s4 }
 0x7e1   :  { %v538_v38 = vpop.permute.xlu0 %537 }
 0x7e2   :  { %v540_v40 = vmul.f32 %v538_v38, %v2036_v34  ;;  %v2138_v38 = vsub.f32 1.0, %v2135_v33 }
 0x7e4   :  { %v543_v41 = vadd.f32 %v542_v39, %v540_v40 }
 0x7e6   :  { %v630_v42 = vrot.slane %v543_v41, 6 }
 0x7e8   :  { %631 = vrot.lane.b32.xlu0 %v630_v42, %s1873_s12  ;;  %v670_v6 = vmul.f32 %v630_v42, %v2039_v35 }
 0x852   :  { %v525_v44 = vpop.permute.xlu1 %524 }
 0x853   :  { %v527_v46 = vmul.f32 %v525_v44, %v2036_v34 }
 0x855   :  { %529 = vst.msk [vmem:[#allocation2] sm:$0x30] %vm528_vm7, %v527_v46  ;;  %v535_v47 = vadd.f32 %v534_v45, %v527_v46 }
 0x856   :  { %531 = vst.msk [vmem:[#allocation2 + $0x6] sm:$0x30] %vm530_vm8, %v527_v46 }
 0x857   :  { %v545_v48 = vrot.slane %v535_v47, 4  ;;  %v660_v12 = vrot.slane %v535_v47, 6 }
 0x859   :  { %1639 = vmatmul.mubr.msk.f32.vlgmr.msra.gmra.mxu1 %vm172_vm4, %v545_v48  ;;  %v662_v14 = vmul.f32 %v660_v12, %v2039_v35 }
 0x85a   :  { %1653 = vmatpush3.msra.mxu1 %v1960_v4  ;;  %1660 = vmatprep.mubr.msk.f32.mxu1 %vm1872_vm0, %v1871_v0  ;;  %v632_v60 = vpop.permute.xlu0 %631 }
 0x85b   :  { %1654 = vmatprep.subr.mxu1 %v1871_v0 }
 0x85c   :  { %1655 = vmatpush3.msra.mxu1 %v1965_v5 }
 0x85d   :  { %1656 = vmatprep.subr.mxu1 %v1871_v0 }
 0x85e   :  { %1657 = vmatpush3.msra.mxu1 %v1976_v8 }
 0x85f   :  { %1658 = vmatprep.subr.mxu1 %v1871_v0 }
 0x860   :  { %1659 = vmatpush3.msra.mxu1 %v1986_v10 }
 0x861   :  { %1674 = vmatprep.subr.mxu1 %v1871_v0 }
 0x919   :  { %v614_v49 = vpop.f32.mrf.mxu1 }
 0x91a   :  { %v619_v50 = vrot.slane %v614_v49, 2 }
 0x91b   :  { %v1640_v51 = vpop.f32.mrf.mxu1 }
 0x91c   :  { %v621_v52 = vadd.f32 %v619_v50, %v2029_v21 }
 0x91e   :  { %1761 = vtanh.f32 %v621_v52  ;;  %v1495_v54 = vmul.f32 -1.442695, %v621_v52 }
 0x920   :  { %1763 = vpow2.f32 %v1495_v54 }
 0x92b   :  { %v1762_v53 = vpop.eup %1761 }
 0x92c   :  { %636 = vrot.lane.b32.xlu1 %v1762_v53, %s1873_s12 }
 0x92d   :  { %v1764_v55 = vpop.eup %1763 }
 0x92e   :  { %v625_v56 = vadd.f32 1.0, %v1764_v55 }
 0x930   :  { %1765 = vrcp.f32 %v625_v56 }
 0x93d   :  { %v1766_v57 = vpop.eup %1765 }
 0x93e   :  { %v634_v61 = vmul.f32 %v1766_v57, %v632_v60 }
 0x99e   :  { %v637_v58 = vpop.permute.xlu1 %636 }
 0x99f   :  { %v639_v59 = vmul.f32 %v1766_v57, %v637_v58 }
 0x9a1   :  { %641 = vrot.lane.b32.xlu1 %v639_v59, %s1873_s12 }
 0xa13   :  { %v642_v62 = vpop.permute.xlu1 %641 }
 0xa14   :  { %v644_v63 = vadd.f32 %v642_v62, %v634_v61 }
 0xa16   :  { %1767 = vtanh.f32 %v644_v63 }
 0xa23   :  { %v1768_v21 = vpop.eup %1767 }
 0xa24   :  { %647 = vrot.lane.b32.xlu0 %v1768_v21, %s1873_s12 }
 0xa28   :  { %665 = vrot.lane.b32.xlu0 %v644_v63, %s1874_s3 }
 0xa96   :  { %v648_v1 = vpop.permute.xlu0 %647 }
 0xa97   :  { %v650_v2 = vmul.f32 %v1766_v57, %v648_v1 }
 0xa99   :  { %652 = vrot.lane.b32.xlu1 %v650_v2, %s1875_s4 }
 0xa9a   :  { %v666_v3 = vpop.permute.xlu0 %665 }
 0xa9b   :  { %v668_v7 = vmul.f32 %v666_v3, %v2036_v34 }
 0xa9d   :  { %v671_v9 = vadd.f32 %v670_v6, %v668_v7 }
 0xa9f   :  { %v755_v11 = vrot.slane %v671_v9, 6 }
 0xaa1   :  { %756 = vrot.lane.b32.xlu0 %v755_v11, %s1873_s12  ;;  %v793_v41 = vmul.f32 %v2138_v38, %v755_v11 }
 0xb0b   :  { %v653_v13 = vpop.permute.xlu1 %652 }
 0xb0c   :  { %v655_v15 = vmul.f32 %v653_v13, %v2036_v34 }
 0xb0e   :  { %657 = vst.msk [vmem:[#allocation2] sm:$0xc0] %vm656_vm9, %v655_v15  ;;  %v663_v16 = vadd.f32 %v662_v14, %v655_v15 }
 0xb0f   :  { %659 = vst.msk [vmem:[#allocation2 + $0x2] sm:$0xc0] %vm658_vm10, %v655_v15 }
 0xb10   :  { %v673_v17 = vrot.slane %v663_v16, 6 }
 0xb12   :  { %1650 = vmatmul.mubr.msk.f32.vlgmr.msra.gmra.mxu0 %vm172_vm4, %v673_v17  ;;  %v785_v45 = vmul.f32 %v2138_v38, %v673_v17 }
 0xb13   :  { %1664 = vmatpush3.msra.mxu0 %v1960_v4  ;;  %1671 = vmatprep.mubr.msk.f32.mxu0 %vm1872_vm0, %v1871_v0  ;;  %v757_v28 = vpop.permute.xlu0 %756 }
 0xb14   :  { %1665 = vmatprep.subr.mxu0 %v1871_v0 }
 0xb15   :  { %1666 = vmatpush3.msra.mxu0 %v1965_v5 }
 0xb16   :  { %1667 = vmatprep.subr.mxu0 %v1871_v0 }
 0xb17   :  { %1668 = vmatpush3.msra.mxu0 %v1976_v8 }
 0xb18   :  { %1669 = vmatprep.subr.mxu0 %v1871_v0 }
 0xb19   :  { %1670 = vmatpush3.msra.mxu0 %v1986_v10 }
 0xbd2   :  { %v742_v34 = vpop.f32.mrf.mxu0 }
 0xbd3   :  { %v746_v35 = vadd.f32 %v742_v34, %v2027_v19 }
 0xbd4   :  { %v1651_v18 = vpop.f32.mrf.mxu0 }
 0xbd5   :  { %1769 = vtanh.f32 %v746_v35  ;;  %v1497_v22 = vmul.f32 -1.442695, %v746_v35 }
 0xbd7   :  { %1771 = vpow2.f32 %v1497_v22 }
 0xbe2   :  { %v1770_v20 = vpop.eup %1769 }
 0xbe3   :  { %761 = vrot.lane.b32.xlu1 %v1770_v20, %s1873_s12 }
 0xbe4   :  { %v1772_v23 = vpop.eup %1771 }
 0xbe5   :  { %v750_v24 = vadd.f32 1.0, %v1772_v23 }
 0xbe7   :  { %1773 = vrcp.f32 %v750_v24 }
 0xbf4   :  { %v1774_v25 = vpop.eup %1773 }
 0xbf5   :  { %v759_v29 = vmul.f32 %v1774_v25, %v757_v28 }
 0xc55   :  { %v762_v26 = vpop.permute.xlu1 %761 }
 0xc56   :  { %v764_v27 = vmul.f32 %v1774_v25, %v762_v26 }
 0xc58   :  { %766 = vrot.lane.b32.xlu1 %v764_v27, %s1873_s12 }
 0xcca   :  { %v767_v30 = vpop.permute.xlu1 %766 }
 0xccb   :  { %v769_v31 = vadd.f32 %v767_v30, %v759_v29 }
 0xccd   :  { %1775 = vtanh.f32 %v769_v31 }
 0xcda   :  { %v1776_v32 = vpop.eup %1775 }
 0xcdb   :  { %772 = vrot.lane.b32.xlu0 %v1776_v32, %s1873_s12 }
 0xcdf   :  { %788 = vrot.lane.b32.xlu0 %v769_v31, %s1874_s3 }
 0xd4d   :  { %v773_v36 = vpop.permute.xlu0 %772 }
 0xd4e   :  { %v775_v37 = vmul.f32 %v1774_v25, %v773_v36 }
 0xd50   :  { %777 = vrot.lane.b32.xlu1 %v775_v37, %s1875_s4 }
 0xd51   :  { %v789_v39 = vpop.permute.xlu0 %788 }
 0xd52   :  { %v791_v40 = vmul.f32 %v789_v39, %v2135_v33 }
 0xd54   :  { %v794_v42 = vadd.f32 %v793_v41, %v791_v40 }
 0xd56   :  { %v880_v43 = vrot.slane %v794_v42, 6 }
 0xd58   :  { %881 = vrot.lane.b32.xlu0 %v880_v43, %s1873_s12  ;;  %v918_v63 = vmul.f32 %v880_v43, %v2138_v38 }
 0xdc2   :  { %v778_v44 = vpop.permute.xlu1 %777 }
 0xdc3   :  { %v780_v46 = vmul.f32 %v778_v44, %v2135_v33 }
 0xdc5   :  { %781 = vst.msk [vmem:[#allocation2 + $0x8] sm:$0x3] %vm276_vm2, %v780_v46  ;;  %v786_v47 = vadd.f32 %v785_v45, %v780_v46 }
 0xdc6   :  { %782 = vst.msk [vmem:[#allocation2 + $0x6] sm:$0x3] %vm278_vm3, %v780_v46 }
 0xdc7   :  { %1661 = vmatmul.mubr.msk.f32.vlgmr.msra.gmra.mxu1 %vm172_vm4, %v786_v47  ;;  %v908_v3 = vrot.slane %v786_v47, 6 }
 0xdc8   :  { %1675 = vmatpush3.msra.mxu1 %v1960_v4  ;;  %1682 = vmatprep.mubr.msk.f32.mxu1 %vm1872_vm0, %v1871_v0 }
 0xdc9   :  { %1676 = vmatprep.subr.mxu1 %v1871_v0  ;;  %v910_v7 = vmul.f32 %v908_v3, %v2138_v38  ;;  %v1213_v3 = vld [vmem:[%s2285_s7 + $0x28] sm:$0xff] }
 0xdca   :  { %1677 = vmatpush3.msra.mxu1 %v1965_v5 }
 0xdcb   :  { %1678 = vmatprep.subr.mxu1 %v1871_v0 }
 0xdcc   :  { %1679 = vmatpush3.msra.mxu1 %v1976_v8 }
 0xdcd   :  { %1680 = vmatprep.subr.mxu1 %v1871_v0 }
 0xdce   :  { %1681 = vmatpush3.msra.mxu1 %v1986_v10  ;;  %v882_v10 = vpop.permute.xlu0 %881 }
 0xdcf   :  { %1712 = vmatprep.subr.mxu1 %v1871_v0 }
 0xe87   :  { %v864_v48 = vpop.f32.mrf.mxu1 }
 0xe88   :  { %v869_v49 = vrot.slane %v864_v48, 6 }
 0xe89   :  { %v1662_v4 = vpop.f32.mrf.mxu1 }
 0xe8a   :  { %v871_v50 = vadd.f32 %v869_v49, %v2027_v19 }
 0xe8c   :  { %1777 = vtanh.f32 %v871_v50  ;;  %v1499_v5 = vmul.f32 -1.442695, %v871_v50 }
 0xe8e   :  { %1779 = vpow2.f32 %v1499_v5 }
 0xe99   :  { %v1778_v51 = vpop.eup %1777 }
 0xe9a   :  { %886 = vrot.lane.b32.xlu1 %v1778_v51, %s1873_s12 }
 0xe9b   :  { %v1780_v52 = vpop.eup %1779 }
 0xe9c   :  { %v875_v53 = vadd.f32 1.0, %v1780_v52 }
 0xe9e   :  { %1781 = vrcp.f32 %v875_v53 }
 0xeab   :  { %v1782_v8 = vpop.eup %1781 }
 0xeac   :  { %v884_v56 = vmul.f32 %v1782_v8, %v882_v10 }
 0xf0c   :  { %v887_v54 = vpop.permute.xlu1 %886 }
 0xf0d   :  { %v889_v55 = vmul.f32 %v1782_v8, %v887_v54 }
 0xf0f   :  { %891 = vrot.lane.b32.xlu1 %v889_v55, %s1873_s12 }
 0xf81   :  { %v892_v57 = vpop.permute.xlu1 %891 }
 0xf82   :  { %v894_v58 = vadd.f32 %v892_v57, %v884_v56  ;;  %v1162_v57 = vld [vmem:[%s2283_s5] sm:$0xff] }
 0xf84   :  { %1783 = vtanh.f32 %v894_v58 }
 0xf91   :  { %v1784_v59 = vpop.eup %1783 }
 0xf92   :  { %897 = vrot.lane.b32.xlu0 %v1784_v59, %s1873_s12 }
 0xf96   :  { %913 = vrot.lane.b32.xlu0 %v894_v58, %s1874_s3 }
0x1004   :  { %v898_v60 = vpop.permute.xlu0 %897 }
0x1005   :  { %v900_v61 = vmul.f32 %v1782_v8, %v898_v60  ;;  %v1163_v60 = vld [vmem:[%s2283_s5 + $0x8] sm:$0xff] }
0x1007   :  { %902 = vrot.lane.b32.xlu1 %v900_v61, %s1875_s4  ;;  %v1219_v61 = vld [vmem:[%s2285_s7 + $0x58] sm:$0xff] }
0x1008   :  { %v914_v62 = vpop.permute.xlu0 %913  ;;  %1685 = vmatprep.subr.mxu0 %v1219_v61 }
0x1009   :  { %v916_v21 = vmul.f32 %v914_v62, %v2135_v33  ;;  %v1218_v62 = vld [vmem:[%s2285_s7 + $0x50] sm:$0xff] }
0x100b   :  { %v919_v1 = vadd.f32 %v918_v63, %v916_v21  ;;  %v1217_v63 = vld [vmem:[%s2285_s7 + $0x48] sm:$0xff]  ;;  %v1216_v21 = vld [vmem:[%s2285_s7 + $0x40] sm:$0xff] }
0x100d   :  { %v1006_v2 = vrot.slane %v919_v1, 6  ;;  %v1215_v1 = vld [vmem:[%s2285_s7 + $0x38] sm:$0xff] }
0x100f   :  { %1007 = vrot.lane.b32.xlu0 %v1006_v2, %s1873_s12  ;;  %v1044_v36 = vmul.f32 %v1006_v2, %v2138_v38  ;;  %v1214_v2 = vld [vmem:[%s2285_s7 + $0x30] sm:$0xff] }
0x1079   :  { %v903_v6 = vpop.permute.xlu1 %902 }
0x107a   :  { %v905_v9 = vmul.f32 %v903_v6, %v2135_v33  ;;  %v1212_v6 = vld [vmem:[%s2285_s7 + $0x20] sm:$0xff] }
0x107c   :  { %906 = vst.msk [vmem:[#allocation2 + $0x8] sm:$0xc] %vm400_vm5, %v905_v9  ;;  %v911_v11 = vadd.f32 %v910_v7, %v905_v9  ;;  %v1211_v7 = vld [vmem:[%s2285_s7 + $0x18] sm:$0xff] }
0x107d   :  { %907 = vst.msk [vmem:[#allocation2 + $0x2] sm:$0xc] %vm402_vm6, %v905_v9 }
0x107e   :  { %v921_v12 = vrot.slane %v911_v11, 2  ;;  %v1034_v40 = vrot.slane %v911_v11, 6  ;;  %v1210_v11 = vld [vmem:[%s2285_s7 + $0x10] sm:$0xff] }
0x1080   :  { %1672 = vmatmul.mubr.msk.f32.vlgmr.msra.gmra.mxu0 %vm172_vm4, %v921_v12  ;;  %v1036_v42 = vmul.f32 %v1034_v40, %v2138_v38 }
0x1081   :  { %v1008_v24 = vpop.permute.xlu0 %1007  ;;  %1686 = vmatpush3.msra.mxu0 %v1219_v61 }
0x1082   :  { %1687 = vmatprep.subr.mxu0 %v1218_v62 }
0x1083   :  { %1688 = vmatpush3.msra.mxu0 %v1218_v62 }
0x1084   :  { %1689 = vmatprep.subr.mxu0 %v1217_v63 }
0x1085   :  { %1690 = vmatpush3.msra.mxu0 %v1217_v63 }
0x1086   :  { %1691 = vmatprep.subr.mxu0 %v1216_v21 }
0x1087   :  { %1692 = vmatpush3.msra.mxu0 %v1216_v21 }
0x1088   :  { %1693 = vmatprep.subr.mxu0 %v1215_v1 }
0x1089   :  { %1694 = vmatpush3.msra.mxu0 %v1215_v1 }
0x108a   :  { %1695 = vmatprep.subr.mxu0 %v1214_v2 }
0x108b   :  { %1696 = vmatpush3.msra.mxu0 %v1214_v2 }
0x108c   :  { %1697 = vmatprep.subr.mxu0 %v1213_v3 }
0x108d   :  { %1698 = vmatpush3.msra.mxu0 %v1213_v3 }
0x108e   :  { %1699 = vmatprep.subr.mxu0 %v1212_v6 }
0x108f   :  { %1700 = vmatpush3.msra.mxu0 %v1212_v6 }
0x1090   :  { %1701 = vmatprep.subr.mxu0 %v1211_v7 }
0x1091   :  { %1702 = vmatpush3.msra.mxu0 %v1211_v7 }
0x1092   :  { %1703 = vmatprep.subr.mxu0 %v1210_v11 }
0x1093   :  { %1704 = vmatpush3.msra.mxu0 %v1210_v11 }
0x1140   :  { %v990_v13 = vpop.f32.mrf.mxu0 }
0x1141   :  { %v995_v14 = vrot.slane %v990_v13, 4  ;;  %v1209_v13 = vld [vmem:[%s2285_s7 + $0x8] sm:$0xff] }
0x1142   :  { %v1673_v15 = vpop.f32.mrf.mxu0  ;;  %1705 = vmatprep.subr.mxu0 %v1209_v13 }
0x1143   :  { %v997_v16 = vadd.f32 %v995_v14, %v2027_v19  ;;  %1706 = vmatpush3.msra.mxu0 %v1209_v13  ;;  %v1208_v14 = vld [vmem:[%s2285_s7] sm:$0xff] }
0x1144   :  { %1707 = vmatprep.subr.mxu0 %v1208_v14 }
0x1145   :  { %1785 = vtanh.f32 %v997_v16  ;;  %v1501_v34 = vmul.f32 -1.442695, %v997_v16  ;;  %1708 = vmatpush3.msra.mxu0 %v1208_v14 }
0x1147   :  { %1787 = vpow2.f32 %v1501_v34 }
0x1152   :  { %v1786_v17 = vpop.eup %1785 }
0x1153   :  { %1012 = vrot.lane.b32.xlu1 %v1786_v17, %s1873_s12 }
0x1154   :  { %v1788_v35 = vpop.eup %1787 }
0x1155   :  { %v1001_v18 = vadd.f32 1.0, %v1788_v35 }
0x1157   :  { %1789 = vrcp.f32 %v1001_v18 }
0x1164   :  { %v1790_v20 = vpop.eup %1789 }
0x1165   :  { %v1010_v25 = vmul.f32 %v1790_v20, %v1008_v24 }
0x11c5   :  { %v1013_v22 = vpop.permute.xlu1 %1012 }
0x11c6   :  { %v1015_v23 = vmul.f32 %v1790_v20, %v1013_v22 }
0x11c8   :  { %1017 = vrot.lane.b32.xlu1 %v1015_v23, %s1873_s12 }
0x123a   :  { %v1018_v26 = vpop.permute.xlu1 %1017 }
0x123b   :  { %v1020_v27 = vadd.f32 %v1018_v26, %v1010_v25 }
0x123d   :  { %1791 = vtanh.f32 %v1020_v27 }
0x124a   :  { %v1792_v28 = vpop.eup %1791 }
0x124b   :  { %1023 = vrot.lane.b32.xlu0 %v1792_v28, %s1873_s12  ;;  %v1312_v28 = vld [vmem:[%s2284_s6 + $0x8] sm:$0xff] }
0x124f   :  { %1039 = vrot.lane.b32.xlu0 %v1020_v27, %s1874_s3  ;;  %v1311_v27 = vld [vmem:[%s2284_s6] sm:$0xff] }
0x12bd   :  { %v1024_v29 = vpop.permute.xlu0 %1023 }
0x12be   :  { %v1026_v30 = vmul.f32 %v1790_v20, %v1024_v29 }
0x12c0   :  { %1028 = vrot.lane.b32.xlu1 %v1026_v30, %s1875_s4 }
0x12c1   :  { %v1040_v31 = vpop.permute.xlu0 %1039 }
0x12c2   :  { %v1042_v32 = vmul.f32 %v1040_v31, %v2135_v33 }
0x12c4   :  { %v1045_v37 = vadd.f32 %v1044_v36, %v1042_v32 }
0x12c6   :  { %v1132_v39 = vrot.slane %v1045_v37, 6 }
0x12c8   :  { %1133 = vrot.lane.b32.xlu0 %v1132_v39, %s1873_s12 }
0x1332   :  { %v1029_v41 = vpop.permute.xlu1 %1028 }
0x1333   :  { %v1031_v43 = vmul.f32 %v1029_v41, %v2135_v33 }
0x1335   :  { %1032 = vst.msk [vmem:[#allocation2 + $0x8] sm:$0x30] %vm528_vm7, %v1031_v43  ;;  %v1037_v44 = vadd.f32 %v1036_v42, %v1031_v43  ;;  %v1388_v42 = vld [vmem:[%s2287_s9 + $0x18] sm:$0xff] }
0x1336   :  { %1033 = vst.msk [vmem:[#allocation2 - $0x2] sm:$0x30] %vm530_vm8, %v1031_v43  ;;  %v1387_v43 = vld [vmem:[%s2287_s9 + $0x10] sm:$0xff] }
0x1337   :  { %v1047_v45 = vrot.slane %v1037_v44, 4  ;;  %v1386_v44 = vld [vmem:[%s2287_s9 + $0x8] sm:$0xff] }
0x1339   :  { %1683 = vmatmul.mubr.msk.f32.vlgmr.msra.gmra.mxu1 %vm172_vm4, %v1047_v45  ;;  %v1385_v45 = vld [vmem:[%s2287_s9] sm:$0xff] }
0x133a   :  { %1720 = vmatprep.mubr.msk.f32.mxu1 %vm1872_vm0, %v1871_v0  ;;  %v1134_v8 = vpop.permute.xlu0 %1133  ;;  %1713 = vmatpush3.msra.mxu1 %v1388_v42 }
0x133b   :  { %1714 = vmatprep.subr.mxu1 %v1871_v0 }
0x133c   :  { %1715 = vmatpush3.msra.mxu1 %v1387_v43 }
0x133d   :  { %1716 = vmatprep.subr.mxu1 %v1871_v0 }
0x133e   :  { %1717 = vmatpush3.msra.mxu1 %v1386_v44 }
0x133f   :  { %1718 = vmatprep.subr.mxu1 %v1871_v0 }
0x1340   :  { %1719 = vmatpush3.msra.mxu1 %v1385_v45 }
0x13f9   :  { %v1116_v46 = vpop.f32.mrf.mxu1 }
0x13fa   :  { %v1121_v47 = vrot.slane %v1116_v46, 2  ;;  %v1877_v46 = vmov 1983009808  }
0x13fb   :  { %v1684_v48 = vpop.f32.mrf.mxu1 }
0x13fc   :  { %v1123_v49 = vadd.f32 %v1121_v47, %v2027_v19  ;;  %v1876_v19 = vmov 0   ;;  %v1329_v47 = vunpack.c.l.s4 %v1877_v46  ;;  %v1331_v48 = vlaneseq }
0x13fd   :  { %1735 = vset.pattern.permute.xlu0 %v1876_v19  ;;  %1736 = vset.pattern.permute.xlu1 %v1876_v19 }
0x13fe   :  { %1793 = vtanh.f32 %v1123_v49  ;;  %v1503_v4 = vmul.f32 -1.442695, %v1123_v49  ;;  %v1504_v49 = vld [vmem:[%s2286_s8] ss:$0 sm:$0xff] }
0x1400   :  { %1795 = vpow2.f32 %v1503_v4  ;;  %v1332_v4 = vshrl.u32 %v1331_v48, 7 }
0x140b   :  { %v1794_v38 = vpop.eup %1793 }
0x140c   :  { %1138 = vrot.lane.b32.xlu1 %v1794_v38, %s1873_s12  ;;  %v1330_v38 = vunpack.c.0.s8 %v1329_v47 }
0x140d   :  { %v1796_v50 = vpop.eup %1795 }
0x140e   :  { %v1127_v51 = vadd.f32 1.0, %v1796_v50 }
0x1410   :  { %1797 = vrcp.f32 %v1127_v51 }
0x141d   :  { %v1798_v5 = vpop.eup %1797 }
0x141e   :  { %v1136_v54 = vmul.f32 %v1798_v5, %v1134_v8 }
0x147e   :  { %v1139_v52 = vpop.permute.xlu1 %1138 }
0x147f   :  { %v1141_v53 = vmul.f32 %v1798_v5, %v1139_v52 }
0x1481   :  { %1143 = vrot.lane.b32.xlu1 %v1141_v53, %s1873_s12  ;;  %v1333_v53 = vsub.s32 %v1330_v38, %v1332_v4 }
0x14f3   :  { %v1144_v55 = vpop.permute.xlu1 %1143 }
0x14f4   :  { %v1146_v10 = vadd.f32 %v1144_v55, %v1136_v54 }
0x14f6   :  { %1799 = vtanh.f32 %v1146_v10 }
0x1503   :  { %v1800_v56 = vpop.eup %1799 }
0x1504   :  { %1149 = vrot.lane.b32.xlu0 %v1800_v56, %s1873_s12 }
0x1508   :  { %1166 = vperm.xlu0 %1735, %v1162_v57  }
0x1576   :  { %v1150_v58 = vpop.permute.xlu0 %1149 }
0x1577   :  { %v1152_v59 = vmul.f32 %v1798_v5, %v1150_v58 }
0x1579   :  { %1154 = vrot.lane.b32.xlu1 %v1152_v59, %s1875_s4 }
0x157d   :  { %1171 = vperm.xlu1 %1736, %v1163_v60  }
0x15eb   :  { %v1155_v9 = vpop.permute.xlu1 %1154 }
0x15ec   :  { %v1157_v12 = vmul.f32 %v1155_v9, %v2135_v33  ;;  %v1167_v33 = vpop.permute.xlu0 %1166 }
0x15ee   :  { %1158 = vst.msk [vmem:[#allocation2 + $0x8] sm:$0xc0] %vm656_vm9, %v1157_v12 }
0x15ef   :  { %1159 = vst.msk [vmem:[#allocation2 - $0x6] sm:$0xc0] %vm658_vm10, %v1157_v12 }
0x15f5   :  { %v1161_v34 = vld [vmem:[#allocation2 + $0x8] sm:$0xff] }
0x15f6   :  { %v1160_v15 = vld [vmem:[#allocation2] sm:$0xff] }
0x15f7   :  { %v1174_v16 = vmul.f32 %v1167_v33, %v1160_v15 }
0x15f8   :  { %v1172_v17 = vpop.permute.xlu1 %1171 }
0x15f9   :  { %1191 = vrot.lane.b32.xlu1 %v1174_v16, %s1873_s12  ;;  %v1175_v35 = vmul.f32 %v1172_v17, %v1161_v34  ;;  %v1179_v18 = vrot.slane %v1174_v16, 6  ;;  %v1186_v20 = vrot.slane %v1174_v16, 2 }
0x15fb   :  { %v1180_v22 = vrot.slane %v1175_v35, 6  ;;  %v1187_v23 = vrot.slane %v1175_v35, 2  ;;  %1193 = vrot.lane.b32.xlu0 %v1175_v35, %s1873_s12  ;;  %v1184_v31 = vsel %vm1178_vm12, 0.0, %v1179_v18 }
0x15fd   :  { %v1188_v24 = vsel %vm1185_vm11, %v1186_v20, %v1187_v23  ;;  %v1190_v25 = vsel %vm1185_vm11, %v1187_v23, 0.0  ;;  %v1181_v26 = vsel %vm1178_vm12, %v1179_v18, %v1180_v22  ;;  %v1507_v18 = vld [vmem:[%s2288_s10] ss:$0 sm:$0xff] }
0x15fe   :  { %1198 = vrot.lane.b32.xlu1 %v1188_v24, %s1875_s4 }
0x15ff   :  { %1200 = vrot.lane.b32.xlu0 %v1190_v25, %s1875_s4 }
0x1602   :  { %1315 = vperm.xlu1 %1736, %v1311_v27  }
0x1603   :  { %1320 = vperm.xlu0 %1735, %v1312_v28  }
0x166b   :  { %v1192_v29 = vpop.permute.xlu1 %1191 }
0x166c   :  { %v1204_v32 = vsel %vm172_vm4, %v1184_v31, %v1192_v29 }
0x166d   :  { %v1194_v30 = vpop.permute.xlu0 %1193 }
0x166e   :  { %v1205_v37 = vsel %vm172_vm4, %v1181_v26, %v1194_v30 }
0x1670   :  { %v1199_v36 = vpop.permute.xlu1 %1198 }
0x1671   :  { %v1206_v39 = vsel %vm84_vm1, %v1204_v32, %v1199_v36  ;;  %v1201_v40 = vpop.permute.xlu0 %1200 }
0x1672   :  { %v1207_v41 = vsel %vm84_vm1, %v1205_v37, %v1201_v40  ;;  %1709 = vmatprep.mubr.msk.f32.mxu0 %vm1227_vm13, %v1206_v39 }
0x1673   :  { %1710 = vmatmul.mubr.msk.f32.vlgmr.msra.gmra.mxu0 %vm1227_vm13, %v1207_v41 }
0x167d   :  { %v1316_v0 = vpop.permute.xlu1 %1315 }
0x167e   :  { %v1321_v54 = vpop.permute.xlu0 %1320 }
0x1733   :  { %v1711_v50 = vpop.f32.mrf.mxu0 }
0x1734   :  { %v1306_v51 = vadd.f32 %v1711_v50, %v1504_v49 }
0x1735   :  { %v1300_v5 = vpop.f32.mrf.mxu0 }
0x1736   :  { %v1310_v52 = vmax.f32 %v1306_v51, 0.0  ;;  %v1301_v8 = vadd.f32 %v1504_v49, %v1300_v5 }
0x1738   :  { %v1324_v55 = vmul.f32 %v1321_v54, %v1310_v52  ;;  %v1309_v10 = vmax.f32 %v1301_v8, 0.0 }
0x173a   :  { %v1344_v19 = vcombine.high %v1324_v55, %v1324_v55  ;;  %v1351_v56 = vrot.slane %v1324_v55, %v1333_v53  ;;  %v1323_v57 = vmul.f32 %v1316_v0, %v1309_v10 }
0x173c   :  { %v1358_v58 = vrot.slane %v1344_v19, %v1333_v53  ;;  %v1327_v59 = vcombine.high %v1323_v57, %v1323_v57  ;;  %v1359_v60 = vcombine.high %v1351_v56, %v1351_v56  ;;  %v1334_v61 = vrot.slane %v1323_v57, %v1333_v53 }
0x173d   :  { %v1374_v6 = vsel %vm1369_vm14, %v1351_v56, -inf }
0x173e   :  { %v1360_v62 = vcombine.high %v1358_v58, %v1358_v58  ;;  %v1341_v63 = vrot.slane %v1327_v59, %v1333_v53  ;;  %v1342_v21 = vcombine.high %v1334_v61, %v1334_v61  ;;  %v1370_v2 = vsel %vm1369_vm14, %v1334_v61, -inf }
0x173f   :  { %v1376_v7 = vsel %vm1369_vm14, %v1359_v60, -inf  ;;  %v1378_v11 = vsel %vm1369_vm14, %v1358_v58, -inf  ;;  %v1375_v33 = vmax.f32 %v1370_v2, %v1374_v6 }
0x1740   :  { %v1343_v1 = vcombine.high %v1341_v63, %v1341_v63  ;;  %v1372_v3 = vsel %vm1369_vm14, %v1341_v63, -inf  ;;  %v1371_v9 = vsel %vm1369_vm14, %v1342_v21, -inf  ;;  %v1380_v12 = vsel %vm1369_vm14, %v1360_v62, -inf }
0x1741   :  { %v1377_v14 = vmax.f32 %v1371_v9, %v1376_v7  ;;  %v1379_v15 = vmax.f32 %v1372_v3, %v1378_v11 }
0x1742   :  { %v1373_v13 = vsel %vm1369_vm14, %v1343_v1, -inf }
0x1743   :  { %v1381_v16 = vmax.f32 %v1373_v13, %v1380_v12  ;;  %v1382_v17 = vmax.f32 %v1375_v33, %v1377_v14 }
0x1745   :  { %v1383_v34 = vmax.f32 %v1379_v15, %v1381_v16 }
0x1747   :  { %v1384_v35 = vmax.f32 %v1382_v17, %v1383_v34 }
0x1749   :  { %1721 = vmatmul.mubr.msk.f32.vlgmr.msra.gmra.mxu1 %vm172_vm4, %v1384_v35 }
0x1809   :  { %v1465_v20 = vpop.f32.mrf.mxu1 }
0x180a   :  { %v1466_v22 = vadd.f32 %v1507_v18, %v1465_v20 }
0x180b   :  { %v1722_v23 = vpop.f32.mrf.mxu1 }
0x180c   :  { %1469 = vst [vmem:[#allocation8] sm:$0x3] %v1466_v22 }
0x180d   :  { %1852 = shalt.err (!%p1849_p0)
}
0x180e   :  { %1479 = dma.vmem_to_hbm [thread:$0]  %s1477_s28, 32, %s2289_s11, [#allocation5]  }
0x180f   :  { %1865 = dma.done.wait [#allocation5], 32  }
0x1810   :  { %1866 = vsyncadd [#allocation5], 4294967264 }
0x1811   :  { %1483 = vsyncpa [#allocation4], 1 }
0x1812   :  { %1484 = vsyncpa [#allocation7], 1 }
0x1813   :  { %1485 = vsyncpa [#allocation5], 1 }

</bundles_post_ra>
